<compile_context>
chip_gen: v5e
topology: v5e:2x2
jax: 0.10.0
libtpu: 0.0.40
codegen_flags: <defaults>
</compile_context>

<pallas_src>
import numpy as np
import jax
import jax.numpy as jnp
from jax.experimental import pallas as pl
from jax.experimental.pallas import tpu as pltpu


def _round_up(x, m):
    return ((x + m - 1) // m) * m


def _bilinear_matrix(in_size, out_size):
    """Row-interpolation matrix matching F.interpolate(mode='bilinear',
    align_corners=False) along one axis.  shape (out_size, in_size)."""
    scale = in_size / out_size
    m = np.zeros((out_size, in_size), dtype=np.float32)
    for i in range(out_size):
        src = (i + 0.5) * scale - 0.5
        src = max(src, 0.0)
        i0 = min(int(np.floor(src)), in_size - 1)
        i1 = min(i0 + 1, in_size - 1)
        lam = src - i0
        m[i, i0] += 1.0 - lam
        m[i, i1] += lam
    return m


def _shift_interp_matrices(grid_h, grid_w, H, W):
    """mk[k] @ x_tokens == (zero-padded, bilinearly-resized image) shifted by the
    k-th 3x3 tap (k = ky*3 + kx), flattened to (H*W, grid_h*grid_w).  numpy f32."""
    mh = _bilinear_matrix(grid_h, H)                       # (H, grid_h)
    mw = _bilinear_matrix(grid_w, W)                       # (W, grid_w)
    mh_pad = np.zeros((H + 2, grid_h), np.float32)
    mh_pad[1:H + 1] = mh
    mw_pad = np.zeros((W + 2, grid_w), np.float32)
    mw_pad[1:W + 1] = mw
    mpad = np.einsum("ph,qw->pqhw", mh_pad, mw_pad).reshape(
        H + 2, W + 2, grid_h * grid_w)                     # padded interp tensor
    mk = np.stack(
        [mpad[ky:ky + H, kx:kx + W, :].reshape(H * W, grid_h * grid_w)
         for ky in range(3) for kx in range(3)],
        axis=0,
    )
    return mk                                              # (9, H*W, N)


def _vmem_budget_bytes():
    """~60% of physical VMEM for this generation (v7x: 64 MiB, v5e/v6e: 128 MiB)."""
    try:
        cap = int(pltpu.get_tpu_info().vmem_capacity_bytes)
    except Exception:
        cap = 64 * 1024 * 1024                             # conservative fallback
    return max(int(cap * 0.6), 32 * 1024 * 1024)


def _pick_hw_tile(hw, k_pad, mid, c_pad, budget):
    """Largest lane-dense tile whose double-buffered working set fits the budget."""
    hw_ceil = _round_up(hw, 128)
    for t in (2048, 1024, 512, 256, 128):
        if t > hw_ceil:
            continue
        need = (2 * k_pad * t * 2          # Mcat_T tile, bf16, double-buffered
                + 2 * mid * k_pad * 2      # XW_T, bf16, double-buffered
                + 2 * c_pad * t * 4        # output tile, f32, double-buffered
                + 4 * mid * t * 4          # in-kernel f32/bf16 intermediates
                + 2 * c_pad * mid * 2      # W2
                + 4 * (mid + c_pad) * 128 * 4)   # biases (lane-padded in VMEM)
        if need <= budget:
            return t
    return min(128, hw_ceil)


def occupancy_head_kernel(xw_ref, mcat_ref, bnb_ref, w2_ref, b2_ref, out_ref):
    # xw_ref:   (1, MID, K_pad) bf16  per-batch  x @ (W1 * bn_scale), tap-major columns
    # mcat_ref: (K_pad, T)      bf16  fused interp+pad+3x3-shift matrix (transposed) tile
    # bnb_ref:  (MID, 1)        f32   folded BatchNorm bias (scale already in XW)
    # w2_ref:   (C_pad, MID)    bf16  1x1 conv weight, output channels padded to C_pad
    # b2_ref:   (C_pad, 1)      f32   1x1 conv bias, padded
    # out_ref:  (1, C_pad, T)   f32   output, lane-dense along the HW tile
    h = jnp.dot(xw_ref[0], mcat_ref[...],
                preferred_element_type=jnp.float32)        # (MID, T) f32: resize+pad+3x3
    y = jnp.maximum(h + bnb_ref[...], 0.0)                 # BN bias + ReLU epilogue
    o = jnp.dot(w2_ref[...], y.astype(jnp.bfloat16),
                preferred_element_type=jnp.float32) + b2_ref[...]   # (C_pad, T) f32
    out_ref[...] = o[None]                                 # unmasked lane-dense stores


def occupancy_head_forward(x, conv1_w, bn_gamma, bn_beta, bn_mean, bn_var,
                           conv2_w, conv2_b, grid_size, target_size,
                           final_channels=1, bn_eps=1e-5):
    """x: (B, N, C_in) tokens.  conv weights in PyTorch OIHW layout."""
    B, N, C_in = x.shape
    gh, gw = grid_size
    H, W, Z = target_size
    HW = H * W
    C_out = Z * final_channels
    MID = conv1_w.shape[0]
    assert N == gh * gw and conv1_w.shape[1] == C_in
    assert conv2_w.shape[:2] == (C_out, MID)

    K = 9 * N
    K_pad = _round_up(K, 128)
    C_pad = _round_up(C_out, 8)

    # ---- per-generation tiling -----------------------------------------------------
    budget = _vmem_budget_bytes()
    hw_tile = _pick_hw_tile(HW, K_pad, MID, C_pad, budget)
    HW_pad = _round_up(HW, hw_tile)
    n_hw = HW_pad // hw_tile

    # ---- host-side parameter / constant prep (layout only, cheap) -------------------
    # Fused bilinear + pad + 3x3-shift matrix, TRANSPOSED: (K_pad, HW_pad), row k*N+n.
    mk = _shift_interp_matrices(gh, gw, H, W)                        # np (9, HW, N)
    mcat_t_np = np.zeros((K_pad, HW_pad), np.float32)
    mcat_t_np[:K, :HW] = np.transpose(mk, (0, 2, 1)).reshape(K, HW)
    mcat_t = jnp.asarray(mcat_t_np, dtype=jnp.bfloat16)

    # Conv1 OIHW (MID, C_in, 3, 3) -> tap-major (9, C_in, MID), with BN scale folded in.
    inv = jnp.asarray(bn_gamma, jnp.float32) / jnp.sqrt(
        jnp.asarray(bn_var, jnp.float32) + bn_eps)
    w1 = jnp.asarray(conv1_w, jnp.float32).transpose(2, 3, 1, 0).reshape(9, C_in, MID)
    w1s = w1 * inv[None, None, :]
    bnb = (jnp.asarray(bn_beta, jnp.float32)
           - jnp.asarray(bn_mean, jnp.float32) * inv).reshape(MID, 1)

    # Hoisted per-batch XW_T[b, m, k*N+n] = sum_c x[b,n,c] * W1s[k,c,m]   (bf16, padded).
    xw = jnp.einsum("bnc,kcm->bmkn", x.astype(jnp.float32), w1s,
                    precision=jax.lax.Precision.HIGHEST).reshape(B, MID, K)
    xw = jnp.pad(xw.astype(jnp.bfloat16), ((0, 0), (0, 0), (0, K_pad - K)))

    # Conv2 1x1: OIHW (C_out, MID, 1, 1) -> (C_pad, MID) bf16, bias (C_pad, 1) f32.
    w2p = jnp.zeros((C_pad, MID), jnp.bfloat16).at[:C_out].set(
        jnp.asarray(conv2_w, jnp.float32).reshape(C_out, MID).astype(jnp.bfloat16))
    b2p = jnp.zeros((C_pad, 1), jnp.float32).at[:C_out, 0].set(
        jnp.asarray(conv2_b, jnp.float32))

    # ---- pallas_call: grid = (HW tiles, batch) -- batch innermost so the dominant
    #      Mcat_T stream is fetched once per tile, not once per (tile, batch) ----------
    flops = 2 * B * HW_pad * K_pad * MID + 2 * B * HW_pad * MID * C_pad
    bytes_accessed = (mcat_t.size * 2 + B * n_hw * MID * K_pad * 2
                      + B * C_pad * HW_pad * 4 + C_pad * MID * 2
                      + (MID + C_pad) * 4)
    cost = pl.CostEstimate(flops=int(flops), transcendentals=0,
                           bytes_accessed=int(bytes_accessed))

    out = pl.pallas_call(
        occupancy_head_kernel,
        out_shape=jax.ShapeDtypeStruct((B, C_pad, HW_pad), jnp.float32),
        grid=(n_hw, B),
        in_specs=[
            pl.BlockSpec((1, MID, K_pad), lambda j, b: (b, 0, 0)),   # XW_T (per batch)
            pl.BlockSpec((K_pad, hw_tile), lambda j, b: (0, j)),     # Mcat_T tile
            pl.BlockSpec((MID, 1), lambda j, b: (0, 0)),             # folded BN bias
            pl.BlockSpec((C_pad, MID), lambda j, b: (0, 0)),         # conv2 weight
            pl.BlockSpec((C_pad, 1), lambda j, b: (0, 0)),           # conv2 bias
        ],
        out_specs=pl.BlockSpec((1, C_pad, hw_tile), lambda j, b: (b, 0, j)),
        compiler_params=pltpu.CompilerParams(
            dimension_semantics=("parallel", "parallel"),
            vmem_limit_bytes=int(budget)),
        cost_estimate=cost,
    )(xw, mcat_t, bnb, w2p, b2p)

    # Drop channel / HW padding and recover the PyTorch output layout:
    # (B, C_pad, HW_pad) -> (B, C_out, HW) -> view(B, fc, Z, H, W) -> permute(0,1,3,4,2)
    out = out[:, :C_out, :HW].reshape(B, final_channels, Z, H, W)
    return out.transpose(0, 1, 3, 4, 2)


def reference_forward(x, conv1_w, bn_gamma, bn_beta, bn_mean, bn_var,
                      conv2_w, conv2_b, grid_size, target_size,
                      final_channels=1, bn_eps=1e-5):
    """Independent plain-JAX f32 implementation of the PyTorch module (XLA convs)."""
    B, N, C_in = x.shape
    gh, gw = grid_size
    H, W, Z = target_size
    hp = jax.lax.Precision.HIGHEST
    img = x.transpose(0, 2, 1).reshape(B, C_in, gh, gw)             # NCHW
    mh = jnp.asarray(_bilinear_matrix(gh, H))                       # (H, gh)
    mw = jnp.asarray(_bilinear_matrix(gw, W))                       # (W, gw)
    up = jnp.einsum("Hh,bchw,Ww->bcHW", mh, img, mw, precision=hp)  # bilinear resize
    z = jax.lax.conv_general_dilated(
        up, jnp.asarray(conv1_w), (1, 1), ((1, 1), (1, 1)),
        dimension_numbers=("NCHW", "OIHW", "NCHW"), precision=hp)
    inv = bn_gamma / jnp.sqrt(bn_var + bn_eps)
    z = z * inv[None, :, None, None] + (bn_beta - bn_mean * inv)[None, :, None, None]
    z = jnp.maximum(z, 0.0)
    z = jax.lax.conv_general_dilated(
        z, jnp.asarray(conv2_w), (1, 1), "VALID",
        dimension_numbers=("NCHW", "OIHW", "NCHW"), precision=hp)
    z = z + jnp.asarray(conv2_b)[None, :, None, None]
    z = z.reshape(B, final_channels, Z, H, W)
    return z.transpose(0, 1, 3, 4, 2)


if __name__ == "__main__":
    # Small, module-consistent shapes.
    B = 2
    embed_dim = 32
    grid_size = (4, 4)                 # grid_h, grid_w  -> N = 16 tokens
    target_size = (16, 16, 8)          # target_h, target_w, target_z
    final_channels = 1
    MID = 256                          # hard-coded in the PyTorch module

    gh, gw = grid_size
    H, W, Z = target_size
    N = gh * gw
    C_out = Z * final_channels

    key = jax.random.PRNGKey(0)
    ks = jax.random.split(key, 8)

    # Input tokens (B, N, embed_dim) -- the layout the PyTorch module receives.
    x = jax.random.normal(ks[0], (B, N, embed_dim), dtype=jnp.float32)

    # Parameters in PyTorch layouts (Conv2d weights are OIHW).
    conv1_w = 0.05 * jax.random.normal(ks[1], (MID, embed_dim, 3, 3), jnp.float32)
    bn_gamma = 1.0 + 0.1 * jax.random.normal(ks[2], (MID,), jnp.float32)
    bn_beta = 0.1 * jax.random.normal(ks[3], (MID,), jnp.float32)
    bn_mean = 0.1 * jax.random.normal(ks[4], (MID,), jnp.float32)
    bn_var = jnp.abs(1.0 + 0.1 * jax.random.normal(ks[5], (MID,), jnp.float32))
    conv2_w = 0.05 * jax.random.normal(ks[6], (C_out, MID, 1, 1), jnp.float32)
    conv2_b = 0.01 * jnp.arange(C_out, dtype=jnp.float32)

    out = occupancy_head_forward(x, conv1_w, bn_gamma, bn_beta, bn_mean, bn_var,
                                 conv2_w, conv2_b, grid_size, target_size,
                                 final_channels)
    out = jax.block_until_ready(out)
    assert out.shape == (B, final_channels, H, W, Z), out.shape

    # Validate against an independent plain-JAX f32 reference of the PyTorch module.
    # Tolerance accounts for the bf16 matmul operands (f32 accumulation) in the kernel.
    ref = reference_forward(x, conv1_w, bn_gamma, bn_beta, bn_mean, bn_var,
                            conv2_w, conv2_b, grid_size, target_size,
                            final_channels)
    np.testing.assert_allclose(np.asarray(out), np.asarray(ref),
                               rtol=5e-2, atol=5e-2)

    print("KERNEL_OK")
</pallas_src>

<mosaic_0001>
module attributes {stable_mosaic.version = 11 : i64} {
  func.func @occupancy_head_kernel(%arg0: i32, %arg1: i32, %arg2: memref<1x256x256xbf16, #tpu.memory_space<vmem>>, %arg3: memref<256x256xbf16, #tpu.memory_space<vmem>>, %arg4: memref<256x1xf32, #tpu.memory_space<vmem>>, %arg5: memref<8x256xbf16, #tpu.memory_space<vmem>>, %arg6: memref<8x1xf32, #tpu.memory_space<vmem>>, %arg7: memref<1x8x256xf32, #tpu.memory_space<vmem>>) attributes {dimension_semantics = [#tpu.dimension_semantics<parallel>, #tpu.dimension_semantics<parallel>], iteration_bounds = array<i64: 1, 2>, scalar_prefetch = 0 : i64, scratch_operands = 0 : i64, tpu.core_type = #tpu.core_type<tc>, window_params = [{transform_indices = @transform_0, window_bounds = array<i64: 1, 256, 256>}, {transform_indices = @transform_1, window_bounds = array<i64: 256, 256>}, {pipeline_mode = #tpu.pipeline_mode<synchronous>, transform_indices = @transform_2, window_bounds = array<i64: 256, 1>}, {pipeline_mode = #tpu.pipeline_mode<synchronous>, transform_indices = @transform_3, window_bounds = array<i64: 8, 256>}, {pipeline_mode = #tpu.pipeline_mode<synchronous>, transform_indices = @transform_4, window_bounds = array<i64: 8, 1>}, {transform_indices = @transform_5, window_bounds = array<i64: 1, 8, 256>}]} {
    %c0 = arith.constant 0 : index
    %c0_0 = arith.constant 0 : index
    %c0_1 = arith.constant 0 : index
    %0 = vector.load %arg2[%c0, %c0_0, %c0_1] : memref<1x256x256xbf16, #tpu.memory_space<vmem>>, vector<1x256x256xbf16>
    %1 = vector.shape_cast %0 : vector<1x256x256xbf16> to vector<256x256xbf16>
    %c0_2 = arith.constant 0 : index
    %c0_3 = arith.constant 0 : index
    %2 = vector.load %arg3[%c0_2, %c0_3] : memref<256x256xbf16, #tpu.memory_space<vmem>>, vector<256x256xbf16>
    %cst = arith.constant dense<0.000000e+00> : vector<256x256xf32>
    %3 = tpu.matmul %1, %2, %cst {dimension_numbers = #tpu.dot_dimension_numbers<[1], [0], [0], [1], [0, 0, 1, 1], [], []>} : vector<256x256xbf16>, vector<256x256xbf16>, vector<256x256xf32> -> vector<256x256xf32>
    %c0_4 = arith.constant 0 : index
    %c0_5 = arith.constant 0 : index
    %4 = vector.load %arg4[%c0_4, %c0_5] : memref<256x1xf32, #tpu.memory_space<vmem>>, vector<256x1xf32>
    %5 = vector.broadcast %4 : vector<256x1xf32> to vector<256x256xf32>
    %6 = arith.addf %3, %5 : vector<256x256xf32>
    %cst_6 = arith.constant 0.000000e+00 : f32
    %7 = vector.broadcast %cst_6 : f32 to vector<256x256xf32>
    %8 = arith.maximumf %6, %7 : vector<256x256xf32>
    %c0_7 = arith.constant 0 : index
    %c0_8 = arith.constant 0 : index
    %9 = vector.load %arg5[%c0_7, %c0_8] : memref<8x256xbf16, #tpu.memory_space<vmem>>, vector<8x256xbf16>
    %10 = arith.truncf %8 : vector<256x256xf32> to vector<256x256xbf16>
    %cst_9 = arith.constant dense<0.000000e+00> : vector<8x256xf32>
    %11 = tpu.matmul %9, %10, %cst_9 {dimension_numbers = #tpu.dot_dimension_numbers<[1], [0], [0], [1], [0, 0, 1, 1], [], []>} : vector<8x256xbf16>, vector<256x256xbf16>, vector<8x256xf32> -> vector<8x256xf32>
    %c0_10 = arith.constant 0 : index
    %c0_11 = arith.constant 0 : index
    %12 = vector.load %arg6[%c0_10, %c0_11] : memref<8x1xf32, #tpu.memory_space<vmem>>, vector<8x1xf32>
    %13 = vector.broadcast %12 : vector<8x1xf32> to vector<8x256xf32>
    %14 = arith.addf %11, %13 : vector<8x256xf32>
    %15 = vector.shape_cast %14 : vector<8x256xf32> to vector<1x8x256xf32>
    %c0_12 = arith.constant 0 : index
    %c0_13 = arith.constant 0 : index
    %c0_14 = arith.constant 0 : index
    %16 = vector.load %arg7[%c0_12, %c0_13, %c0_14] : memref<1x8x256xf32, #tpu.memory_space<vmem>>, vector<1x8x256xf32>
    tpu.vector_store %arg7[%c0_12, %c0_13, %c0_14], %15 {strides = array<i32>} : memref<1x8x256xf32, #tpu.memory_space<vmem>>, vector<1x8x256xf32>,
    return
  }
  func.func @transform_0(%arg0: i32, %arg1: i32) -> (i32, i32, i32) {
    %c0_i32 = arith.constant 0 : i32
    %c0_i32_0 = arith.constant 0 : i32
    %c0_i32_1 = arith.constant 0 : i32
    return %arg1, %c0_i32, %c0_i32_0 : i32, i32, i32
  }
  func.func @transform_1(%arg0: i32, %arg1: i32) -> (i32, i32) {
    %c0_i32 = arith.constant 0 : i32
    %c0_i32_0 = arith.constant 0 : i32
    return %c0_i32, %arg0 : i32, i32
  }
  func.func @transform_2(%arg0: i32, %arg1: i32) -> (i32, i32) {
    %c0_i32 = arith.constant 0 : i32
    %c0_i32_0 = arith.constant 0 : i32
    %c0_i32_1 = arith.constant 0 : i32
    return %c0_i32, %c0_i32_0 : i32, i32
  }
  func.func @transform_3(%arg0: i32, %arg1: i32) -> (i32, i32) {
    %c0_i32 = arith.constant 0 : i32
    %c0_i32_0 = arith.constant 0 : i32
    %c0_i32_1 = arith.constant 0 : i32
    return %c0_i32, %c0_i32_0 : i32, i32
  }
  func.func @transform_4(%arg0: i32, %arg1: i32) -> (i32, i32) {
    %c0_i32 = arith.constant 0 : i32
    %c0_i32_0 = arith.constant 0 : i32
    %c0_i32_1 = arith.constant 0 : i32
    return %c0_i32, %c0_i32_0 : i32, i32
  }
  func.func @transform_5(%arg0: i32, %arg1: i32) -> (i32, i32, i32) {
    %c0_i32 = arith.constant 0 : i32
    %c0_i32_0 = arith.constant 0 : i32
    return %arg1, %c0_i32, %arg0 : i32, i32, i32
  }
}

</mosaic_0001>

<bundles_post_ra>
// kernel: tpu_custom_call.1
= control target key start
LH: loop header
LB: loop body
LE: loop exit
PB: predicated region body
PF: predicated region fallthrough
CT: control target
= control target key end

     0   :  { %10 = vsyncpa [#allocation3], 0  ;;  %s2725_s0 = inlined_call_operand.hbm [shape: bf16[2,256,256], index: 0, kind: input, shape index: {}]   ;;  %s2726_s1 = inlined_call_operand.vmem [shape: bf16[256,256], index: 1, kind: input, shape index: {}]   ;;  %s2727_s2 = inlined_call_operand.vmem [shape: f32[256,1], index: 2, kind: input, shape index: {}]   ;;  %s2728_s3 = inlined_call_operand.vmem [shape: bf16[8,256], index: 3, kind: input, shape index: {}]   ;;  %s2729_s4 = inlined_call_operand.vmem [shape: f32[8,1], index: 4, kind: input, shape index: {}]   ;;  %s2730_s5 = inlined_call_operand.hbm [shape: f32[2,8,256], index: 5, kind: output, shape index: {}]  }
   0x1   :  { %12 = vsyncpa [#allocation3 + $0x1], 0 }
   0x2   :  { %13 = vsyncpa [#allocation4], 0 }
   0x3   :  { %15 = vsyncpa [#allocation4 + $0x1], 0  ;;  %s2046_s18 = smov 0   ;;  %s2048_s19 = smov 0  }
   0x4   :  { %s2050_s20 = smov 0   ;;  %s2052_s21 = smov 0  }
   0x5   :  { %s2054_s22 = smov 0   ;;  %s2056_s23 = smov 0  }
   0x6 LB: > { %s1493_s24 = sadd.s32 4294967295, %s2011_s23   ;;  %s1494_s25 = sadd.s32 4294967294, %s2011_s23   ;;  %s2011_s23 = sphi %s2056_s23, %s21_s23   ;;  %s2007_s22 = sphi %s2054_s22, %s2754_s22   ;;  %s2003_s21 = sphi %s2052_s21, %s2753_s21   ;;  %s1999_s20 = sphi %s2050_s20, %s2752_s20   ;;  %s1995_s19 = sphi %s2048_s19, %s2751_s19   ;;  %s1991_s18 = sphi %s2046_s18, %s2750_s18  }
   0x7   : > { %s30_s26 = sadd.s32 1, %s2007_s22  ;;  %s40_s27 = sadd.s32 1, %s1999_s20 }
   0x8   : > { %p31_p0 = scmp.ge.s32.totalorder %s30_s26, 2  ;;  %p47_p1 = scmp.ne.s32.totalorder %s1999_s20, %s1995_s19 }
   0x9   : > { %p48_p2 = scmp.eq.s32.totalorder %s2011_s23, 0  ;;  %p53_p3 = scmp.ne.s32.totalorder %s1995_s19, %s1991_s18 }
   0xa   : > { %s2756_s26 = smov (%p31_p0, %s30_s26), 0  ;;  %p54_p5 = scmp.eq.s32.totalorder %s1493_s24, 0 }
   0xb   : > { %p2087_p4 = por %p48_p2, %p47_p1  ;;  %s37_s29 = ssub.s32 %s2007_s22, %s2756_s26 }
   0xc   : > { %p168_p6 = scmp.eq.s32.totalorder %s1493_s24, 1  ;;  %p38_p7 = scmp.eq.s32.totalorder %s37_s29, 0 }
   0xd   : > { %p2093_p8 = por %p54_p5, %p53_p3  ;;  %p174_p10 = scmp.eq.s32.totalorder %s1494_s25, 1 }
   0xe   : > { %p2097_p9 = por %p168_p6, %p47_p1  ;;  %p1497_p12 = scmp.ge.s32.totalorder %s2011_s23, 2 }
   0xf   : > { %s2102_s7 = scalar_select %p38_p7, %s1999_s20, %s40_s27  }
  0x10   : > { %p2104_p11 = por %p174_p10, %p53_p3  ;;  %p1843_p13 = scmp.lt.s32.totalorder %s2011_s23, 2 }
  0x11   : > { %s212_s9 = sand.u32 1, %s1999_s20   ;;  %s1765_s11 = sshll.u32 %s2007_s22, 8 }
  0x12   : > { %s1498_s10 = sshll.u32 %s212_s9, 8  ;;  %s221_s14 = scalar_lea.hbm %s2725_s0, %s1765_s11 }
  0x13   : > { %s216_s15 = scalar_lea.vmem [#allocation2], %s1498_s10  ;;  %s222_s17 = sshll.u32 %s221_s14, 4  ;;  %s223_s17 = int_to_ptr.hbm [resolvable:$true] %s222_s17 }
  0x14   : > { %s224_s16 = sshll.u32 %s216_s15, 4  ;;  %p1836_p0 = pnand %p1843_p13, %p2087_p4  ;;  %s225_s16 = int_to_ptr.vmem [resolvable:$true] %s224_s16 }
  0x15   : > { %p1501_p1 = scmp.ge.s32.totalorder %s2011_s23, 1  ;;  %s213_s24 = scalar_lea.sflag [#allocation3], %s212_s9 }
  0x16   : > { %s2013_s25 = smov 128   ;;  %s2014_s27 = smov 8  }
  0x17   : > { %1838 = dma.hbm_to_vmem [thread:$0]  (!%p1836_p0), %s223_s17, 4096, %s225_s16, %s213_s24, %s2013_s25, %s2013_s25, %s2014_s27  }
  0x18   : > { %p232_p2 = scmp.lt.s32.totalorder %s2011_s23, 3 }
  0x1a   : > { %p233_p3 = pnand %p1501_p1, %p232_p2 }
  0x1c   : > { %236 = sbr.rel (%p233_p3) target bundleno = 632 (0x278), region = 40 }
  0x21   : > { %s2120_s29 = sand.u32 1, %s1995_s19  }
  0x22   : > { %s1502_s10 = sshll.u32 %s2120_s29, 8  ;;  %s239_s11 = scalar_lea.sflag [#allocation3], %s2120_s29 }
  0x23   : > { %s2124_s12 = scalar_lea.vmem [#allocation2], %s1502_s10 }
  0x24   : > { %1982 = dma.done.wait (%p2093_p8), %s239_s11, 4096  }
  0x25   : > { %1984 = vsyncadd (%p2093_p8), %s239_s11, 4294963200  ;;  %v2015_v0 = vmov 0   ;;  %v376_v1 = vld [vmem:[%s2727_s2 + $0xf0] sm:$0xff]  ;;  %v1813_v4 = vld [vmem:[%s2726_s1 + $0x74] sm:$0xf0]  ;;  %s1503_s28 = sshll.u32 %s2120_s29, 4 }
  0x26   : > { %1897 = vset.pattern.permute.xlu1 %v2015_v0  ;;  %1896 = vset.pattern.permute.xlu0 %v2015_v0  ;;  %v360_v2 = vld [vmem:[%s2727_s2 + $0x70] sm:$0xff]  ;;  %v1692_v6 = vld [vmem:[%s2726_s1 + $0x78] sm:$0xf0]  ;;  %v1829_v13 = vld [vmem:[%s2726_s1 + $0xf4] sm:$0xf0]  ;;  %s274_s9 = scalar_lea.vmem [#allocation5], %s1503_s28 }
  0x27   : > { %1898 = vset.pattern.permute.xlu2 %v2015_v0  ;;  %v1690_v3 = vld [vmem:[%s2726_s1 + $0x70] sm:$0xf]  ;;  %530 = vperm.xlu1 %1897, %v376_v1   ;;  %v1812_v5 = vld [vmem:[%s2726_s1 + $0x74] sm:$0xf]  ;;  %v1756_v10 = vld [vmem:[%s2726_s1 + $0xf8] sm:$0xf0] }
  0x28   : > { %450 = vperm.xlu0 %1896, %v360_v2   ;;  %v1691_v7 = vor.u32 %v1813_v4, %v1690_v3  ;;  %v1695_v8 = vor.u32 %v1812_v5, %v1692_v6  ;;  %v1828_v9 = vld [vmem:[%s2726_s1 + $0xf4] sm:$0xf]  ;;  %v1754_v11 = vld [vmem:[%s2726_s1 + $0xf0] sm:$0xf]  ;;  %v1682_v14 = vld [vmem:[%s2726_s1 + $0x60] sm:$0xf] }
  0x29   : > { %v1759_v12 = vor.u32 %v1828_v9, %v1756_v10  ;;  %v1811_v15 = vld [vmem:[%s2726_s1 + $0x64] sm:$0xf0]  ;;  %v1755_v16 = vor.u32 %v1829_v13, %v1754_v11  ;;  %v1810_v18 = vld [vmem:[%s2726_s1 + $0x64] sm:$0xf]  ;;  %v1684_v19 = vld [vmem:[%s2726_s1 + $0x68] sm:$0xf0] }
  0x2a   : > { %858 = vmatpush.bf16.msra.mxu0 %v1691_v7  ;;  %1036 = vmatpush.bf16.msra.mxu2 %v1695_v8  ;;  %v1683_v17 = vor.u32 %v1811_v15, %v1682_v14  ;;  %v1826_v20 = vld [vmem:[%s2726_s1 + $0xe4] sm:$0xf]  ;;  %v1687_v21 = vor.u32 %v1810_v18, %v1684_v19  ;;  %v1748_v22 = vld [vmem:[%s2726_s1 + $0xe8] sm:$0xf0]  ;;  %v377_v23 = vld [vmem:[%s2727_s2 + $0xf8] sm:$0xff]  ;;  %s1830_s13 = sshll.u32 %s2003_s21, 4 }
  0x2b   : > { %1125 = vmatpush.bf16.msra.mxu3 %v1759_v12  ;;  %v358_v24 = vld [vmem:[%s2727_s2 + $0x60] sm:$0xff]  ;;  %947 = vmatpush.bf16.msra.mxu1 %v1755_v16  ;;  %v1751_v25 = vor.u32 %v1826_v20, %v1748_v22  ;;  %v1827_v27 = vld [vmem:[%s2726_s1 + $0xe4] sm:$0xf0]  ;;  %v361_v28 = vld [vmem:[%s2727_s2 + $0x78] sm:$0xff]  ;;  %s1392_s16 = scalar_lea.hbm %s2730_s5, %s1830_s13  ;;  %s1394_s30 = sshll.u32 %s274_s9, 4  ;;  %s1395_s30 = int_to_ptr.vmem [resolvable:$true] %s1394_s30 }
  0x2c   : > { %440 = vperm.xlu2 %1898, %v358_v24   ;;  %v1746_v26 = vld [vmem:[%s2726_s1 + $0xe0] sm:$0xf]  ;;  %v1674_v30 = vld [vmem:[%s2726_s1 + $0x50] sm:$0xf]  ;;  %v1809_v31 = vld [vmem:[%s2726_s1 + $0x54] sm:$0xf0] }
  0x2d   : > { %v1747_v29 = vor.u32 %v1827_v27, %v1746_v26  ;;  %v1808_v32 = vld [vmem:[%s2726_s1 + $0x54] sm:$0xf]  ;;  %v1675_v33 = vor.u32 %v1809_v31, %v1674_v30  ;;  %v1676_v34 = vld [vmem:[%s2726_s1 + $0x58] sm:$0xf0]  ;;  %v1738_v39 = vld [vmem:[%s2726_s1 + $0xd0] sm:$0xf] }
  0x2e   : > { %859 = vmatpush.bf16.msra.mxu0 %v1683_v17  ;;  %1037 = vmatpush.bf16.msra.mxu2 %v1687_v21  ;;  %v1824_v35 = vld [vmem:[%s2726_s1 + $0xd4] sm:$0xf]  ;;  %v1740_v36 = vld [vmem:[%s2726_s1 + $0xd8] sm:$0xf0]  ;;  %v1679_v37 = vor.u32 %v1808_v32, %v1676_v34  ;;  %v1825_v40 = vld [vmem:[%s2726_s1 + $0xd4] sm:$0xf0] }
  0x2f   : > { %1126 = vmatpush.bf16.msra.mxu3 %v1751_v25  ;;  %535 = vperm.xlu1 %1897, %v377_v23   ;;  %v1743_v38 = vor.u32 %v1824_v35, %v1740_v36  ;;  %v1666_v41 = vld [vmem:[%s2726_s1 + $0x40] sm:$0xf]  ;;  %v1739_v42 = vor.u32 %v1825_v40, %v1738_v39  ;;  %v1807_v43 = vld [vmem:[%s2726_s1 + $0x44] sm:$0xf0]  ;;  %v1806_v44 = vld [vmem:[%s2726_s1 + $0x44] sm:$0xf] }
  0x30   : > { %948 = vmatpush.bf16.msra.mxu1 %v1747_v29  ;;  %455 = vperm.xlu0 %1896, %v361_v28   ;;  %v1668_v45 = vld [vmem:[%s2726_s1 + $0x48] sm:$0xf0]  ;;  %v1822_v46 = vld [vmem:[%s2726_s1 + $0xc4] sm:$0xf]  ;;  %v1667_v48 = vor.u32 %v1807_v43, %v1666_v41  ;;  %v1730_v52 = vld [vmem:[%s2726_s1 + $0xc0] sm:$0xf] }
  0x31   : > { %v1732_v47 = vld [vmem:[%s2726_s1 + $0xc8] sm:$0xf0]  ;;  %v1671_v49 = vor.u32 %v1806_v44, %v1668_v45  ;;  %v1823_v53 = vld [vmem:[%s2726_s1 + $0xc4] sm:$0xf0]  ;;  %v374_v55 = vld [vmem:[%s2727_s2 + $0xe0] sm:$0xff]  ;;  %s1396_s17 = sshll.u32 %s1392_s16, 4  ;;  %s1397_s17 = int_to_ptr.hbm [resolvable:$true] %s1396_s17 }
  0x32   : > { %860 = vmatpush.bf16.msra.mxu0 %v1675_v33  ;;  %1038 = vmatpush.bf16.msra.mxu2 %v1679_v37  ;;  %v375_v50 = vld [vmem:[%s2727_s2 + $0xe8] sm:$0xff]  ;;  %v1735_v54 = vor.u32 %v1822_v46, %v1732_v47  ;;  %v1658_v56 = vld [vmem:[%s2726_s1 + $0x30] sm:$0xf]  ;;  %v1805_v57 = vld [vmem:[%s2726_s1 + $0x34] sm:$0xf0]  ;;  %v1731_v58 = vor.u32 %v1823_v53, %v1730_v52  ;;  %s1379_s24 = scalar_lea.sflag [#allocation4], %s2120_s29 }
  0x33   : > { %v359_v51 = vld [vmem:[%s2727_s2 + $0x68] sm:$0xff]  ;;  %1127 = vmatpush.bf16.msra.mxu3 %v1743_v38  ;;  %v1804_v59 = vld [vmem:[%s2726_s1 + $0x34] sm:$0xf]  ;;  %v1660_v60 = vld [vmem:[%s2726_s1 + $0x38] sm:$0xf0]  ;;  %v1659_v1 = vor.u32 %v1805_v57, %v1658_v56  ;;  %s1943_s25 = sshra.s32 %s1397_s17, 4  ;;  %s1944_s25 = int_to_ptr.hbm [resolvable:$true] %s1943_s25 }
  0x34   : > { %949 = vmatpush.bf16.msra.mxu1 %v1739_v42  ;;  %445 = vperm.xlu2 %1898, %v359_v51   ;;  %v1820_v61 = vld [vmem:[%s2726_s1 + $0xb4] sm:$0xf]  ;;  %v1724_v62 = vld [vmem:[%s2726_s1 + $0xb8] sm:$0xf0]  ;;  %v1722_v63 = vld [vmem:[%s2726_s1 + $0xb0] sm:$0xf]  ;;  %v1663_v2 = vor.u32 %v1804_v59, %v1660_v60  ;;  %p1950_p7 = scmp.lt.s32.totalorder %s1944_s25, %s2730_s5 }
  0x35   : > { %v1821_v0 = vld [vmem:[%s2726_s1 + $0xb4] sm:$0xf0]  ;;  %v1650_v3 = vld [vmem:[%s2726_s1 + $0x20] sm:$0xf]  ;;  %v1727_v4 = vor.u32 %v1820_v61, %v1724_v62  ;;  %v1803_v5 = vld [vmem:[%s2726_s1 + $0x24] sm:$0xf0] }
  0x36   : > { %861 = vmatpush.bf16.msra.mxu0 %v1667_v48  ;;  %1039 = vmatpush.bf16.msra.mxu2 %v1671_v49  ;;  %v1802_v6 = vld [vmem:[%s2726_s1 + $0x24] sm:$0xf]  ;;  %v1652_v7 = vld [vmem:[%s2726_s1 + $0x28] sm:$0xf0]  ;;  %v1723_v8 = vor.u32 %v1821_v0, %v1722_v63  ;;  %v356_v11 = vld [vmem:[%s2727_s2 + $0x50] sm:$0xff]  ;;  %v1651_v14 = vor.u32 %v1803_v5, %v1650_v3  ;;  %s1945_s27 = scalar_lea.hbm %s1944_s25, 16 }
  0x37   : > { %1128 = vmatpush.bf16.msra.mxu3 %v1735_v54  ;;  %525 = vperm.xlu1 %1897, %v375_v50   ;;  %v1818_v9 = vld [vmem:[%s2726_s1 + $0xa4] sm:$0xf]  ;;  %v1716_v10 = vld [vmem:[%s2726_s1 + $0xa8] sm:$0xf0]  ;;  %v1714_v12 = vld [vmem:[%s2726_s1 + $0xa0] sm:$0xf]  ;;  %v1655_v15 = vor.u32 %v1802_v6, %v1652_v7  ;;  %p1946_p4 = scmp.ne.s32.totalorder %s1944_s25, %s1945_s27 }
  0x38   : > { %950 = vmatpush.bf16.msra.mxu1 %v1731_v58  ;;  %520 = vperm.xlu0 %1896, %v374_v55   ;;  %v1819_v13 = vld [vmem:[%s2726_s1 + $0xa4] sm:$0xf0]  ;;  %v1642_v16 = vld [vmem:[%s2726_s1 + $0x10] sm:$0xf]  ;;  %v1719_v17 = vor.u32 %v1818_v9, %v1716_v10  ;;  %v1801_v18 = vld [vmem:[%s2726_s1 + $0x14] sm:$0xf0] }
  0x39   : > { %v1800_v19 = vld [vmem:[%s2726_s1 + $0x14] sm:$0xf]  ;;  %v1644_v20 = vld [vmem:[%s2726_s1 + $0x18] sm:$0xf0]  ;;  %v1715_v22 = vor.u32 %v1819_v13, %v1714_v12  ;;  %v1706_v26 = vld [vmem:[%s2726_s1 + $0x90] sm:$0xf]  ;;  %v1643_v28 = vor.u32 %v1801_v18, %v1642_v16  ;;  %p1947_p5 = pnand %p1946_p4, %p2097_p9 }
  0x3a   : > { %862 = vmatpush.bf16.msra.mxu0 %v1659_v1  ;;  %1040 = vmatpush.bf16.msra.mxu2 %v1663_v2  ;;  %v372_v21 = vld [vmem:[%s2727_s2 + $0xd0] sm:$0xff]  ;;  %v1708_v24 = vld [vmem:[%s2726_s1 + $0x98] sm:$0xf0]  ;;  %v1817_v27 = vld [vmem:[%s2726_s1 + $0x94] sm:$0xf0]  ;;  %v1647_v29 = vor.u32 %v1800_v19, %v1644_v20 }
  0x3b   : > { %1129 = vmatpush.bf16.msra.mxu3 %v1727_v4  ;;  %v1816_v23 = vld [vmem:[%s2726_s1 + $0x94] sm:$0xf]  ;;  %v357_v25 = vld [vmem:[%s2727_s2 + $0x58] sm:$0xff]  ;;  %v1634_v30 = vld [vmem:[%s2726_s1] sm:$0xf]  ;;  %v1707_v35 = vor.u32 %v1817_v27, %v1706_v26  ;;  %p1948_p6 = pneg %p1947_p5 }
  0x3c   : > { %951 = vmatpush.bf16.msra.mxu1 %v1723_v8  ;;  %430 = vperm.xlu2 %1898, %v356_v11   ;;  %v1711_v31 = vor.u32 %v1816_v23, %v1708_v24  ;;  %v1799_v32 = vld [vmem:[%s2726_s1 + $0x4] sm:$0xf0]  ;;  %v1798_v33 = vld [vmem:[%s2726_s1 + $0x4] sm:$0xf]  ;;  %v1636_v34 = vld [vmem:[%s2726_s1 + $0x8] sm:$0xf0] }
  0x3d   : > { %v1814_v36 = vld [vmem:[%s2726_s1 + $0x84] sm:$0xf]  ;;  %v1700_v37 = vld [vmem:[%s2726_s1 + $0x88] sm:$0xf0]  ;;  %v373_v38 = vld [vmem:[%s2727_s2 + $0xd8] sm:$0xff]  ;;  %v1635_v41 = vor.u32 %v1799_v32, %v1634_v30  ;;  %v1639_v42 = vor.u32 %v1798_v33, %v1636_v34 }
  0x3e   : > { %863 = vmatpush.bf16.msra.mxu0 %v1651_v14  ;;  %1041 = vmatpush.bf16.msra.mxu2 %v1655_v15  ;;  %v1698_v39 = vld [vmem:[%s2726_s1 + $0x80] sm:$0xf]  ;;  %v1815_v40 = vld [vmem:[%s2726_s1 + $0x84] sm:$0xf0]  ;;  %v1703_v45 = vor.u32 %v1814_v36, %v1700_v37  ;;  %v1766_v46 = vld [vmem:[%s2124_s12 + $0x4] sm:$0xf] }
  0x3f   : > { %1130 = vmatpush.bf16.msra.mxu3 %v1719_v17  ;;  %510 = vperm.xlu1 %1897, %v372_v21   ;;  %v1506_v43 = vld [vmem:[%s2124_s12] sm:$0xf]  ;;  %v1767_v44 = vld [vmem:[%s2124_s12 + $0x4] sm:$0xf0]  ;;  %v1508_v47 = vld [vmem:[%s2124_s12 + $0x8] sm:$0xf0]  ;;  %v1699_v49 = vor.u32 %v1815_v40, %v1698_v39 }
  0x40   : > { %952 = vmatpush.bf16.msra.mxu1 %v1715_v22  ;;  %435 = vperm.xlu0 %1896, %v357_v25   ;;  %v355_v48 = vld [vmem:[%s2727_s2 + $0x48] sm:$0xff]  ;;  %v1507_v50 = vor.u32 %v1767_v44, %v1506_v43  ;;  %v354_v51 = vld [vmem:[%s2727_s2 + $0x40] sm:$0xff]  ;;  %v1511_v52 = vor.u32 %v1766_v46, %v1508_v47  ;;  %v352_v54 = vld [vmem:[%s2727_s2 + $0x30] sm:$0xff] }
  0x41   : > { %v370_v53 = vld [vmem:[%s2727_s2 + $0xc0] sm:$0xff]  ;;  %v371_v55 = vld [vmem:[%s2727_s2 + $0xc8] sm:$0xff]  ;;  %v353_v56 = vld [vmem:[%s2727_s2 + $0x38] sm:$0xff] }
  0x42   : > { %864 = vmatpush.bf16.msra.mxu0 %v1643_v28  ;;  %1042 = vmatpush.bf16.msra.mxu2 %v1647_v29  ;;  %v1514_v57 = vld [vmem:[%s2124_s12 + $0x10] sm:$0xf]  ;;  %v1769_v58 = vld [vmem:[%s2124_s12 + $0x14] sm:$0xf0]  ;;  %v1768_v59 = vld [vmem:[%s2124_s12 + $0x14] sm:$0xf] }
  0x43   : > { %1131 = vmatpush.bf16.msra.mxu3 %v1711_v31  ;;  %v1516_v60 = vld [vmem:[%s2124_s12 + $0x18] sm:$0xf0]  ;;  %v1515_v62 = vor.u32 %v1769_v58, %v1514_v57  ;;  %v368_v63 = vld [vmem:[%s2727_s2 + $0xb0] sm:$0xff]  ;;  %v350_v1 = vld [vmem:[%s2727_s2 + $0x20] sm:$0xff] }
  0x44   : > { %953 = vmatpush.bf16.msra.mxu1 %v1707_v35  ;;  %515 = vperm.xlu2 %1898, %v373_v38   ;;  %v369_v61 = vld [vmem:[%s2727_s2 + $0xb8] sm:$0xff]  ;;  %v1519_v0 = vor.u32 %v1768_v59, %v1516_v60  ;;  %v366_v2 = vld [vmem:[%s2727_s2 + $0xa0] sm:$0xff]  ;;  %v351_v3 = vld [vmem:[%s2727_s2 + $0x28] sm:$0xff] }
  0x45   : > { %v367_v4 = vld [vmem:[%s2727_s2 + $0xa8] sm:$0xff]  ;;  %v1522_v5 = vld [vmem:[%s2124_s12 + $0x20] sm:$0xf]  ;;  %v1770_v7 = vld [vmem:[%s2124_s12 + $0x24] sm:$0xf] }
  0x46   : > { %865 = vmatpush.bf16.msra.mxu0 %v1635_v41  ;;  %1043 = vmatpush.bf16.msra.mxu2 %v1639_v42  ;;  %v1771_v6 = vld [vmem:[%s2124_s12 + $0x24] sm:$0xf0]  ;;  %v1524_v8 = vld [vmem:[%s2124_s12 + $0x28] sm:$0xf0]  ;;  %v349_v9 = vld [vmem:[%s2727_s2 + $0x18] sm:$0xff] }
  0x47   : > { %1132 = vmatpush.bf16.msra.mxu3 %v1703_v45  ;;  %425 = vperm.xlu1 %1897, %v355_v48   ;;  %v1523_v10 = vor.u32 %v1771_v6, %v1522_v5  ;;  %v348_v11 = vld [vmem:[%s2727_s2 + $0x10] sm:$0xff]  ;;  %v1527_v12 = vor.u32 %v1770_v7, %v1524_v8  ;;  %v346_v14 = vld [vmem:[%s2727_s2] sm:$0xff]  ;;  %v347_v15 = vld [vmem:[%s2727_s2 + $0x8] sm:$0xff] }
  0x48   : > { %954 = vmatpush.bf16.msra.mxu1 %v1699_v49  ;;  %420 = vperm.xlu0 %1896, %v354_v51   ;;  %v364_v13 = vld [vmem:[%s2727_s2 + $0x90] sm:$0xff]  ;;  %v1773_v17 = vld [vmem:[%s2124_s12 + $0x34] sm:$0xf0]  ;;  %v1532_v19 = vld [vmem:[%s2124_s12 + $0x38] sm:$0xf0] }
  0x49   : > { %866 = vmatmul.bf16.vlgmr.msra.gmra.mxu0 %v1507_v50  ;;  %1044 = vmatmul.bf16.vlgmr.msra.gmra.mxu2 %v1507_v50  ;;  %v1530_v16 = vld [vmem:[%s2124_s12 + $0x30] sm:$0xf]  ;;  %v1772_v18 = vld [vmem:[%s2124_s12 + $0x34] sm:$0xf]  ;;  %v1538_v22 = vld [vmem:[%s2124_s12 + $0x40] sm:$0xf] }
  0x4a   : > { %1133 = vmatmul.bf16.vlgmr.msra.gmra.mxu3 %v1511_v52  ;;  %v1531_v20 = vor.u32 %v1773_v17, %v1530_v16  ;;  %v1535_v21 = vor.u32 %v1772_v18, %v1532_v19  ;;  %v1775_v23 = vld [vmem:[%s2124_s12 + $0x44] sm:$0xf0]  ;;  %v1774_v24 = vld [vmem:[%s2124_s12 + $0x44] sm:$0xf]  ;;  %v1540_v25 = vld [vmem:[%s2124_s12 + $0x48] sm:$0xf0] }
  0x4b   : > { %955 = vmatmul.bf16.vlgmr.msra.gmra.mxu1 %v1511_v52  ;;  %v1539_v26 = vor.u32 %v1775_v23, %v1538_v22  ;;  %v1543_v27 = vor.u32 %v1774_v24, %v1540_v25  ;;  %v1546_v30 = vld [vmem:[%s2124_s12 + $0x50] sm:$0xf]  ;;  %v1777_v31 = vld [vmem:[%s2124_s12 + $0x54] sm:$0xf0]  ;;  %v1776_v32 = vld [vmem:[%s2124_s12 + $0x54] sm:$0xf] }
  0x4c   : > { %500 = vperm.xlu2 %1898, %v370_v53   ;;  %v1548_v33 = vld [vmem:[%s2124_s12 + $0x58] sm:$0xf0]  ;;  %v1547_v34 = vor.u32 %v1777_v31, %v1546_v30  ;;  %v1554_v42 = vld [vmem:[%s2124_s12 + $0x60] sm:$0xf]  ;;  %v1779_v43 = vld [vmem:[%s2124_s12 + $0x64] sm:$0xf0] }
  0x4d   : > { %v1551_v35 = vor.u32 %v1776_v32, %v1548_v33  ;;  %v1778_v44 = vld [vmem:[%s2124_s12 + $0x64] sm:$0xf]  ;;  %v1556_v45 = vld [vmem:[%s2124_s12 + $0x68] sm:$0xf0]  ;;  %v1555_v46 = vor.u32 %v1779_v43, %v1554_v42  ;;  %v365_v53 = vld [vmem:[%s2727_s2 + $0x98] sm:$0xff] }
  0x4e   : > { %v1559_v47 = vor.u32 %v1778_v44, %v1556_v45  ;;  %v1780_v57 = vld [vmem:[%s2124_s12 + $0x74] sm:$0xf]  ;;  %v1564_v58 = vld [vmem:[%s2124_s12 + $0x78] sm:$0xf0]  ;;  %v1570_v5 = vld [vmem:[%s2124_s12 + $0x80] sm:$0xf] }
  0x4f   : > { %410 = vperm.xlu1 %1897, %v352_v54   ;;  %v1567_v60 = vor.u32 %v1780_v57, %v1564_v58  ;;  %v1783_v6 = vld [vmem:[%s2124_s12 + $0x84] sm:$0xf0]  ;;  %v1782_v7 = vld [vmem:[%s2124_s12 + $0x84] sm:$0xf]  ;;  %v1572_v8 = vld [vmem:[%s2124_s12 + $0x88] sm:$0xf0] }
  0x50   : > { %505 = vperm.xlu0 %1896, %v371_v55   ;;  %v1562_v55 = vld [vmem:[%s2124_s12 + $0x70] sm:$0xf]  ;;  %v1580_v30 = vld [vmem:[%s2124_s12 + $0x98] sm:$0xf0] }
  0x51   : > { %v1578_v25 = vld [vmem:[%s2124_s12 + $0x90] sm:$0xf] }
  0x54   : > { %415 = vperm.xlu2 %1898, %v353_v56   ;;  %v1781_v56 = vld [vmem:[%s2124_s12 + $0x74] sm:$0xf0] }
  0x55   : > { %v1563_v59 = vor.u32 %v1781_v56, %v1562_v55 }
  0x57   : > { %495 = vperm.xlu1 %1897, %v369_v61  }
  0x58   : > { %490 = vperm.xlu0 %1896, %v368_v63  }
  0x59   : > { %871 = vmatmul.bf16.gmra.mxu0 %v1515_v62  ;;  %1049 = vmatmul.bf16.gmra.mxu2 %v1515_v62 }
  0x5a   : > { %1138 = vmatmul.bf16.gmra.mxu3 %v1519_v0 }
  0x5b   : > { %960 = vmatmul.bf16.gmra.mxu1 %v1519_v0  ;;  %v362_v0 = vld [vmem:[%s2727_s2 + $0x80] sm:$0xff] }
  0x5c   : > { %400 = vperm.xlu2 %1898, %v350_v1  }
  0x5f   : > { %480 = vperm.xlu1 %1897, %v366_v2   ;;  %v363_v2 = vld [vmem:[%s2727_s2 + $0x88] sm:$0xff] }
  0x60   : > { %405 = vperm.xlu0 %1896, %v351_v3  }
  0x64   : > { %485 = vperm.xlu2 %1898, %v367_v4  }
  0x67   : > { %395 = vperm.xlu1 %1897, %v349_v9   ;;  %v1571_v9 = vor.u32 %v1783_v6, %v1570_v5  ;;  %v1586_v6 = vld [vmem:[%s2124_s12 + $0xa0] sm:$0xf] }
  0x68   : > { %390 = vperm.xlu0 %1896, %v348_v11   ;;  %v1575_v11 = vor.u32 %v1782_v7, %v1572_v8 }
  0x69   : > { %876 = vmatmul.bf16.gmra.mxu0 %v1523_v10  ;;  %1054 = vmatmul.bf16.gmra.mxu2 %v1523_v10 }
  0x6a   : > { %1143 = vmatmul.bf16.gmra.mxu3 %v1527_v12 }
  0x6b   : > { %965 = vmatmul.bf16.gmra.mxu1 %v1527_v12 }
  0x6c   : > { %470 = vperm.xlu2 %1898, %v364_v13  }
  0x6f   : > { %380 = vperm.xlu1 %1897, %v346_v14  }
  0x70   : > { %475 = vperm.xlu0 %1896, %v365_v53  }
  0x74   : > { %385 = vperm.xlu2 %1898, %v347_v15  }
  0x77   : > { %465 = vperm.xlu1 %1897, %v363_v2  }
  0x78   : > { %460 = vperm.xlu0 %1896, %v362_v0  }
  0x79   : > { %881 = vmatmul.bf16.gmra.mxu0 %v1531_v20  ;;  %1059 = vmatmul.bf16.gmra.mxu2 %v1531_v20 }
  0x7a   : > { %1148 = vmatmul.bf16.gmra.mxu3 %v1535_v21 }
  0x7b   : > { %970 = vmatmul.bf16.gmra.mxu1 %v1535_v21 }
  0x86   : > { %v2429_v28 = vpop.permute.xlu2 %440 }
  0x89   : > { %886 = vmatmul.bf16.gmra.mxu0 %v1539_v26  ;;  %1064 = vmatmul.bf16.gmra.mxu2 %v1539_v26  ;;  %v1785_v26 = vld [vmem:[%s2124_s12 + $0x94] sm:$0xf0] }
  0x8a   : > { %1153 = vmatmul.bf16.gmra.mxu3 %v1543_v27 }
  0x8b   : > { %975 = vmatmul.bf16.gmra.mxu1 %v1543_v27  ;;  %v1784_v27 = vld [vmem:[%s2124_s12 + $0x94] sm:$0xf] }
  0x8c   : > { %v1583_v42 = vor.u32 %v1784_v27, %v1580_v30 }
  0x8e   : > { %v2431_v29 = vpop.permute.xlu2 %445 }
  0x96   : > { %v2437_v36 = vpop.permute.xlu2 %430 }
  0x99   : > { %891 = vmatmul.bf16.gmra.mxu0 %v1547_v34  ;;  %1069 = vmatmul.bf16.gmra.mxu2 %v1547_v34  ;;  %v2439_v37 = vpop.permute.xlu1 %530  ;;  %v1579_v34 = vor.u32 %v1785_v26, %v1578_v25 }
  0x9a   : > { %v2441_v38 = vpop.permute.xlu0 %450  ;;  %1158 = vmatmul.bf16.gmra.mxu3 %v1551_v35 }
  0x9b   : > { %980 = vmatmul.bf16.gmra.mxu1 %v1551_v35 }
  0x9e   : > { %v2443_v39 = vpop.permute.xlu2 %515 }
  0x9f   : > { %2740 = vst [vmem:[#allocation8_spill] sm:$0xff] %v2443_v39 }
  0xa1   : > { %v2445_v40 = vpop.permute.xlu1 %535 }
  0xa2   : > { %2741 = vst [vmem:[#allocation9_spill] sm:$0xff] %v2445_v40  ;;  %v2447_v41 = vpop.permute.xlu0 %455 }
  0xa6   : > { %v2453_v48 = vpop.permute.xlu2 %500 }
  0xa9   : > { %896 = vmatmul.bf16.gmra.mxu0 %v1555_v46  ;;  %1074 = vmatmul.bf16.gmra.mxu2 %v1555_v46  ;;  %v2455_v49 = vpop.permute.xlu1 %525 }
  0xaa   : > { %1163 = vmatmul.bf16.gmra.mxu3 %v1559_v47  ;;  %v2457_v50 = vpop.permute.xlu0 %520 }
  0xab   : > { %2742 = vst [vmem:[#allocation10_spill] sm:$0xff] %v2457_v50  ;;  %985 = vmatmul.bf16.gmra.mxu1 %v1559_v47 }
  0xae   : > { %v2459_v51 = vpop.permute.xlu2 %415 }
  0xb1   : > { %v2461_v52 = vpop.permute.xlu1 %510 }
  0xb2   : > { %2743 = vst [vmem:[#allocation11_spill] sm:$0xff] %v2461_v52  ;;  %v2466_v54 = vpop.permute.xlu0 %435 }
  0xb6   : > { %v2472_v61 = vpop.permute.xlu2 %400 }
  0xb9   : > { %901 = vmatmul.bf16.gmra.mxu0 %v1563_v59  ;;  %1079 = vmatmul.bf16.gmra.mxu2 %v1563_v59  ;;  %v2474_v62 = vpop.permute.xlu1 %425 }
  0xba   : > { %1168 = vmatmul.bf16.gmra.mxu3 %v1567_v60  ;;  %v2476_v63 = vpop.permute.xlu0 %420 }
  0xbb   : > { %990 = vmatmul.bf16.gmra.mxu1 %v1567_v60 }
  0xbe   : > { %v2481_v1 = vpop.permute.xlu2 %485 }
  0xc1   : > { %v2486_v3 = vpop.permute.xlu1 %410 }
  0xc2   : > { %v2488_v4 = vpop.permute.xlu0 %505 }
  0xc3   : > { %2744 = vst [vmem:[#allocation12_spill] sm:$0xff] %v2488_v4 }
  0xc6   : > { %v867_v10 = vpop.f32.mrf.mxu0  ;;  %v2494_v12 = vpop.permute.xlu2 %470 }
  0xc8   : > { %v956_v13 = vpop.f32.mrf.mxu1 }
  0xc9   : > { %906 = vmatmul.bf16.gmra.mxu0 %v1571_v9  ;;  %1084 = vmatmul.bf16.gmra.mxu2 %v1571_v9  ;;  %v2496_v14 = vpop.permute.xlu1 %495 }
  0xca   : > { %1173 = vmatmul.bf16.gmra.mxu3 %v1575_v11  ;;  %v2498_v15 = vpop.permute.xlu0 %490 }
  0xcb   : > { %995 = vmatmul.bf16.gmra.mxu1 %v1575_v11  ;;  %v1787_v11 = vld [vmem:[%s2124_s12 + $0xa4] sm:$0xf0] }
  0xcc   : > { %v1045_v16 = vpop.f32.mrf.mxu2 }
  0xcd   : > { %v1134_v17 = vpop.f32.mrf.mxu3 }
  0xce   : > { %v869_v18 = vpop.f32.mrf.mxu0  ;;  %v386_v19 = vpop.permute.xlu2 %385 }
  0xcf   : > { %v870_v20 = vadd.f32 %v869_v18, %v386_v19  ;;  %v1786_v18 = vld [vmem:[%s2124_s12 + $0xa4] sm:$0xf] }
  0xd0   : > { %v958_v21 = vpop.f32.mrf.mxu1 }
  0xd1   : > { %v2500_v22 = vpop.permute.xlu1 %480  ;;  %v959_v23 = vadd.f32 %v958_v21, %v870_v20 }
  0xd2   : > { %v2502_v24 = vpop.permute.xlu0 %405 }
  0xd4   : > { %v1047_v31 = vpop.f32.mrf.mxu2 }
  0xd5   : > { %v1048_v32 = vadd.f32 %v1047_v31, %v386_v19  ;;  %v1136_v33 = vpop.f32.mrf.mxu3  ;;  %v1588_v19 = vld [vmem:[%s2124_s12 + $0xa8] sm:$0xf0]  ;;  %v1587_v31 = vor.u32 %v1787_v11, %v1586_v6  ;;  %v1594_v6 = vld [vmem:[%s2124_s12 + $0xb0] sm:$0xf]  ;;  %v1596_v11 = vld [vmem:[%s2124_s12 + $0xb8] sm:$0xf0] }
  0xd6   : > { %v872_v35 = vpop.f32.mrf.mxu0 }
  0xd7   : > { %v1137_v43 = vadd.f32 %v1136_v33, %v1048_v32  ;;  %v1591_v32 = vor.u32 %v1786_v18, %v1588_v19 }
  0xd8   : > { %v961_v44 = vpop.f32.mrf.mxu1 }
  0xd9   : > { %911 = vmatmul.bf16.gmra.mxu0 %v1579_v34  ;;  %1089 = vmatmul.bf16.gmra.mxu2 %v1579_v34  ;;  %v396_v45 = vpop.permute.xlu1 %395  ;;  %v1217_v34 = vmax.f32 %v1137_v43, 0.0 }
  0xda   : > { %1178 = vmatmul.bf16.gmra.mxu3 %v1583_v42  ;;  %v391_v46 = vpop.permute.xlu0 %390 }
  0xdb   : > { %1000 = vmatmul.bf16.gmra.mxu1 %v1583_v42  ;;  %v873_v47 = vadd.f32 %v872_v35, %v391_v46 }
  0xdc   : > { %v1050_v53 = vpop.f32.mrf.mxu2 }
  0xdd   : > { %v962_v55 = vadd.f32 %v961_v44, %v873_v47  ;;  %v1051_v56 = vadd.f32 %v1050_v53, %v391_v46  ;;  %v1139_v57 = vpop.f32.mrf.mxu3  ;;  %v1216_v44 = vmax.f32 %v959_v23, 0.0 }
  0xde   : > { %v874_v58 = vpop.f32.mrf.mxu0 }
  0xdf   : > { %v1140_v59 = vadd.f32 %v1139_v57, %v1051_v56  ;;  %v875_v60 = vadd.f32 %v874_v58, %v396_v45  ;;  %v1218_v7 = vmax.f32 %v962_v55, 0.0 }
  0xe0   : > { %v963_v0 = vpop.f32.mrf.mxu1 }
  0xe1   : > { %v964_v2 = vadd.f32 %v963_v0, %v875_v60  ;;  %v381_v5 = vpop.permute.xlu1 %380 }
  0xe2   : > { %v868_v8 = vadd.f32 %v867_v10, %v381_v5  ;;  %v1046_v9 = vadd.f32 %v1045_v16, %v381_v5 }
  0xe3   : > { %v1220_v20 = vmax.f32 %v964_v2, 0.0 }
  0xe4   : > { %v957_v21 = vadd.f32 %v956_v13, %v868_v8  ;;  %v1135_v25 = vadd.f32 %v1134_v17, %v1046_v9  ;;  %v1052_v26 = vpop.f32.mrf.mxu2  ;;  %v1219_v17 = vmax.f32 %v1140_v59, 0.0  ;;  %v1788_v9 = vld [vmem:[%s2124_s12 + $0xb4] sm:$0xf] }
  0xe5   : > { %v1053_v27 = vadd.f32 %v1052_v26, %v396_v45  ;;  %v1141_v30 = vpop.f32.mrf.mxu3  ;;  %v2512_v33 = vpack.c.bf16 %v1220_v20, %v1218_v7  ;;  %v1789_v7 = vld [vmem:[%s2124_s12 + $0xb4] sm:$0xf0]  ;;  %v1599_v26 = vor.u32 %v1788_v9, %v1596_v11 }
  0xe6   : > { %v877_v35 = vpop.f32.mrf.mxu0  ;;  %v1214_v42 = vmax.f32 %v957_v21, 0.0  ;;  %v1215_v46 = vmax.f32 %v1135_v25, 0.0  ;;  %v1595_v21 = vor.u32 %v1789_v7, %v1594_v6 }
  0xe7   : > { %v1142_v10 = vadd.f32 %v1141_v30, %v1053_v27  ;;  %v878_v16 = vadd.f32 %v877_v35, %v2472_v61 }
  0xe8   : > { %v966_v47 = vpop.f32.mrf.mxu1  ;;  %v2515_v53 = vpack.c.bf16 %v1216_v44, %v1214_v42  ;;  %v2517_v13 = vpack.c.bf16 %v1217_v34, %v1215_v46 }
  0xe9   : > { %v1221_v45 = vmax.f32 %v1142_v10, 0.0  ;;  %v967_v55 = vadd.f32 %v966_v47, %v878_v16  ;;  %916 = vmatmul.bf16.gmra.mxu0 %v1587_v31  ;;  %1094 = vmatmul.bf16.gmra.mxu2 %v1587_v31 }
  0xea   : > { %1183 = vmatmul.bf16.gmra.mxu3 %v1591_v32 }
  0xeb   : > { %1005 = vmatmul.bf16.gmra.mxu1 %v1591_v32  ;;  %v2519_v23 = vpack.c.bf16 %v1221_v45, %v1219_v17  ;;  %v1222_v2 = vmax.f32 %v967_v55, 0.0 }
  0xec   : > { %v1055_v43 = vpop.f32.mrf.mxu2 }
  0xed   : > { %v1056_v56 = vadd.f32 %v1055_v43, %v2472_v61  ;;  %v1144_v57 = vpop.f32.mrf.mxu3  ;;  %v1602_v43 = vld [vmem:[%s2124_s12 + $0xc0] sm:$0xf] }
  0xee   : > { %v879_v58 = vpop.f32.mrf.mxu0 }
  0xef   : > { %v1145_v60 = vadd.f32 %v1144_v57, %v1056_v56  ;;  %v880_v59 = vadd.f32 %v879_v58, %v2502_v24  ;;  %v1791_v56 = vld [vmem:[%s2124_s12 + $0xc4] sm:$0xf0]  ;;  %v1790_v58 = vld [vmem:[%s2124_s12 + $0xc4] sm:$0xf] }
  0xf0   : > { %v968_v0 = vpop.f32.mrf.mxu1 }
  0xf1   : > { %v969_v5 = vadd.f32 %v968_v0, %v880_v59  ;;  %v1223_v32 = vmax.f32 %v1145_v60, 0.0  ;;  %v1604_v60 = vld [vmem:[%s2124_s12 + $0xc8] sm:$0xf0] }
  0xf2   : > { %v1607_v7 = vor.u32 %v1790_v58, %v1604_v60  ;;  %v1795_v58 = vld [vmem:[%s2124_s12 + $0xe4] sm:$0xf0]  ;;  %v1794_v60 = vld [vmem:[%s2124_s12 + $0xe4] sm:$0xf] }
  0xf3   : > { %v1224_v8 = vmax.f32 %v969_v5, 0.0  ;;  %v1603_v5 = vor.u32 %v1791_v56, %v1602_v43  ;;  %v1311_v43 = vld [vmem:[%s2729_s4] sm:$0xff] }
  0xf4   : > { %v1057_v18 = vpop.f32.mrf.mxu2  ;;  %1314 = vperm.xlu2 %1898, %v1311_v43  }
  0xf5   : > { %v1058_v19 = vadd.f32 %v1057_v18, %v2502_v24  ;;  %v1146_v20 = vpop.f32.mrf.mxu3  ;;  %v2528_v25 = vpack.c.bf16 %v1224_v8, %v1222_v2 }
  0xf6   : > { %v882_v61 = vpop.f32.mrf.mxu0 }
  0xf7   : > { %v1147_v27 = vadd.f32 %v1146_v20, %v1058_v19  ;;  %v883_v30 = vadd.f32 %v882_v61, %v2486_v3 }
  0xf8   : > { %v971_v31 = vpop.f32.mrf.mxu1 }
  0xf9   : > { %v1225_v34 = vmax.f32 %v1147_v27, 0.0  ;;  %v972_v35 = vadd.f32 %v971_v31, %v883_v30  ;;  %921 = vmatmul.bf16.gmra.mxu0 %v1595_v21  ;;  %1099 = vmatmul.bf16.gmra.mxu2 %v1595_v21 }
  0xfa   : > { %1188 = vmatmul.bf16.gmra.mxu3 %v1599_v26 }
  0xfb   : > { %1010 = vmatmul.bf16.gmra.mxu1 %v1599_v26  ;;  %v2531_v24 = vpack.c.bf16 %v1225_v34, %v1223_v32  ;;  %v1226_v45 = vmax.f32 %v972_v35, 0.0  ;;  %v1610_v32 = vld [vmem:[%s2124_s12 + $0xd0] sm:$0xf]  ;;  %v1793_v34 = vld [vmem:[%s2124_s12 + $0xd4] sm:$0xf0] }
  0xfc   : > { %v1060_v42 = vpop.f32.mrf.mxu2  ;;  %v1792_v35 = vld [vmem:[%s2124_s12 + $0xd4] sm:$0xf] }
  0xfd   : > { %v1061_v44 = vadd.f32 %v1060_v42, %v2486_v3  ;;  %v1149_v46 = vpop.f32.mrf.mxu3  ;;  %v1612_v42 = vld [vmem:[%s2124_s12 + $0xd8] sm:$0xf0] }
  0xfe   : > { %v884_v10 = vpop.f32.mrf.mxu0 }
  0xff   : > { %v1150_v16 = vadd.f32 %v1149_v46, %v1061_v44  ;;  %v885_v47 = vadd.f32 %v884_v10, %v2459_v51  ;;  %v1611_v10 = vor.u32 %v1793_v34, %v1610_v32  ;;  %v1628_v32 = vld [vmem:[%s2124_s12 + $0xf8] sm:$0xf0] }
 0x100   : > { %v973_v17 = vpop.f32.mrf.mxu1 }
 0x101   : > { %v974_v55 = vadd.f32 %v973_v17, %v885_v47  ;;  %v1227_v18 = vmax.f32 %v1150_v16, 0.0  ;;  %v1615_v16 = vor.u32 %v1792_v35, %v1612_v42 }
 0x103   : > { %v1228_v57 = vmax.f32 %v974_v55, 0.0 }
 0x104   : > { %v1062_v59 = vpop.f32.mrf.mxu2 }
 0x105   : > { %v1063_v0 = vadd.f32 %v1062_v59, %v2459_v51  ;;  %v1151_v2 = vpop.f32.mrf.mxu3  ;;  %v2540_v6 = vpack.c.bf16 %v1228_v57, %v1226_v45  ;;  %v1618_v57 = vld [vmem:[%s2124_s12 + $0xe0] sm:$0xf]  ;;  %v1620_v59 = vld [vmem:[%s2124_s12 + $0xe8] sm:$0xf0] }
 0x106   : > { %v887_v3 = vpop.f32.mrf.mxu0 }
 0x107   : > { %v1152_v8 = vadd.f32 %v1151_v2, %v1063_v0  ;;  %v888_v9 = vadd.f32 %v887_v3, %v2476_v63 }
 0x108   : > { %v976_v11 = vpop.f32.mrf.mxu1 }
 0x109   : > { %v1229_v19 = vmax.f32 %v1152_v8, 0.0  ;;  %v2543_v20 = vadd.f32 %v976_v11, %v888_v9  ;;  %926 = vmatmul.bf16.gmra.mxu0 %v1603_v5  ;;  %1104 = vmatmul.bf16.gmra.mxu2 %v1603_v5  ;;  %v1619_v5 = vor.u32 %v1795_v58, %v1618_v57 }
 0x10a   : > { %1193 = vmatmul.bf16.gmra.mxu3 %v1607_v7 }
 0x10b   : > { %1015 = vmatmul.bf16.gmra.mxu1 %v1607_v7  ;;  %v2545_v51 = vpack.c.bf16 %v1229_v19, %v1227_v18  ;;  %v1623_v7 = vor.u32 %v1794_v60, %v1620_v59  ;;  %v2583_v59 = vpop.permute.xlu0 %475 }
 0x10c   : > { %v1065_v21 = vpop.f32.mrf.mxu2 }
 0x10d   : > { %v1066_v61 = vadd.f32 %v1065_v21, %v2476_v63  ;;  %v1154_v26 = vpop.f32.mrf.mxu3  ;;  %v1626_v21 = vld [vmem:[%s2124_s12 + $0xf0] sm:$0xf] }
 0x10e   : > { %v2548_v27 = vpop.f32.mrf.mxu0 }
 0x10f   : > { %v2550_v30 = vadd.f32 %v1154_v26, %v1066_v61  ;;  %v1797_v61 = vld [vmem:[%s2124_s12 + $0xf4] sm:$0xf0]  ;;  %v1796_v26 = vld [vmem:[%s2124_s12 + $0xf4] sm:$0xf]  ;;  %v890_v40 = vadd.f32 %v2548_v27, %v2474_v62  ;;  %s1949_s12 = scalar_lea.hbm %s2730_s5, 32 }
 0x110   : > { %v2552_v31 = vpop.f32.mrf.mxu1  ;;  %v1627_v42 = vor.u32 %v1797_v61, %v1626_v21  ;;  %p1951_p8 = scmp.lt.s32.totalorder %s1949_s12, %s1945_s27 }
 0x112   : > { %p1952_p10 = por %p1951_p8, %p1950_p7 }
 0x113   : > { %v461_v27 = vpop.permute.xlu0 %460 }
 0x114   : > { %v2558_v44 = vpop.f32.mrf.mxu2  ;;  %p1953_p13 = pnand %p1952_p10, %p1948_p6 }
 0x115   : > { %v2560_v46 = vpop.f32.mrf.mxu3 }
 0x116   : > { %v892_v63 = vpop.f32.mrf.mxu0 }
 0x117   : > { %v893_v61 = vadd.f32 %v892_v63, %v2437_v36 }
 0x118   : > { %v2562_v47 = vpop.f32.mrf.mxu1 }
 0x119   : > { %931 = vmatmul.bf16.gmra.mxu0 %v1611_v10  ;;  %1109 = vmatmul.bf16.gmra.mxu2 %v1611_v10 }
 0x11a   : > { %1198 = vmatmul.bf16.gmra.mxu3 %v1615_v16 }
 0x11b   : > { %1020 = vmatmul.bf16.gmra.mxu1 %v1615_v16  ;;  %v1631_v16 = vor.u32 %v1796_v26, %v1628_v32 }
 0x11c   : > { %v2564_v17 = vpop.f32.mrf.mxu2 }
 0x11d   : > { %v2566_v45 = vpop.f32.mrf.mxu3 }
 0x11e   : > { %v894_v55 = vpop.f32.mrf.mxu0 }
 0x11f   : > { %v895_v26 = vadd.f32 %v894_v55, %v2466_v54 }
 0x120   : > { %v983_v56 = vpop.f32.mrf.mxu1 }
 0x124   : > { %v1072_v0 = vpop.f32.mrf.mxu2 }
 0x125   : > { %v2575_v2 = vpop.f32.mrf.mxu3 }
 0x126   : > { %v897_v3 = vpop.f32.mrf.mxu0 }
 0x127   : > { %v898_v58 = vadd.f32 %v897_v3, %v2429_v28 }
 0x128   : > { %v986_v8 = vpop.f32.mrf.mxu1 }
 0x129   : > { %936 = vmatmul.bf16.gmra.mxu0 %v1619_v5  ;;  %1114 = vmatmul.bf16.gmra.mxu2 %v1619_v5  ;;  %v987_v32 = vadd.f32 %v986_v8, %v898_v58 }
 0x12a   : > { %1203 = vmatmul.bf16.gmra.mxu3 %v1623_v7 }
 0x12b   : > { %1025 = vmatmul.bf16.gmra.mxu1 %v1623_v7  ;;  %v1238_v50 = vmax.f32 %v987_v32, 0.0 }
 0x12c   : > { %v1075_v9 = vpop.f32.mrf.mxu2 }
 0x12d   : > { %v1164_v11 = vpop.f32.mrf.mxu3  ;;  %v1076_v63 = vadd.f32 %v1075_v9, %v2429_v28  ;;  %v1071_v28 = vadd.f32 %v2564_v17, %v2437_v36  ;;  %v466_v36 = vpop.permute.xlu1 %465 }
 0x12e   : > { %v899_v18 = vpop.f32.mrf.mxu0 }
 0x12f   : > { %v900_v5 = vadd.f32 %v899_v18, %v2431_v29  ;;  %v1160_v17 = vadd.f32 %v2566_v45, %v1071_v28 }
 0x130   : > { %v988_v19 = vpop.f32.mrf.mxu1 }
 0x134   : > { %v1077_v34 = vpop.f32.mrf.mxu2 }
 0x135   : > { %v1166_v35 = vpop.f32.mrf.mxu3  ;;  %v1078_v18 = vadd.f32 %v1077_v34, %v2431_v29  ;;  %v1073_v29 = vadd.f32 %v1072_v0, %v2466_v54 }
 0x136   : > { %v902_v10 = vpop.f32.mrf.mxu0 }
 0x137   : > { %v903_v57 = vadd.f32 %v902_v10, %v2441_v38  ;;  %v989_v10 = vadd.f32 %v988_v19, %v900_v5  ;;  %v1162_v54 = vadd.f32 %v2575_v2, %v1073_v29 }
 0x138   : > { %v991_v43 = vpop.f32.mrf.mxu1 }
 0x139   : > { %941 = vmatmul.bf16.gmra.mxu0 %v1627_v42  ;;  %1119 = vmatmul.bf16.gmra.mxu2 %v1627_v42  ;;  %v992_v7 = vadd.f32 %v991_v43, %v903_v57  ;;  %v982_v57 = vadd.f32 %v2562_v47, %v893_v61  ;;  %v1240_v8 = vmax.f32 %v989_v10, 0.0 }
 0x13a   : > { %1208 = vmatmul.bf16.gmra.mxu3 %v1631_v16 }
 0x13b   : > { %1030 = vmatmul.bf16.gmra.mxu1 %v1631_v16  ;;  %v1242_v16 = vmax.f32 %v992_v7, 0.0 }
 0x13c   : > { %v1080_v60 = vpop.f32.mrf.mxu2 }
 0x13d   : > { %v1169_v4 = vpop.f32.mrf.mxu3  ;;  %v1081_v3 = vadd.f32 %v1080_v60, %v2441_v38  ;;  %v979_v60 = vadd.f32 %v2552_v31, %v890_v40  ;;  %v1068_v40 = vadd.f32 %v2558_v44, %v2474_v62  ;;  %v1237_v44 = vmax.f32 %v1162_v54, 0.0 }
 0x13e   : > { %v904_v52 = vpop.f32.mrf.mxu0 }
 0x13f   : > { %v905_v21 = vadd.f32 %v904_v52, %v2447_v41  ;;  %v984_v52 = vadd.f32 %v983_v56, %v895_v26  ;;  %v1170_v58 = vadd.f32 %v1169_v4, %v1081_v3  ;;  %v1234_v56 = vmax.f32 %v982_v57, 0.0 }
 0x140   : > { %v993_v42 = vpop.f32.mrf.mxu1  ;;  %v1165_v4 = vadd.f32 %v1164_v11, %v1076_v63  ;;  %v1291_v26 = vpack.c.bf16 %v1240_v8, %v1238_v50 }
 0x141   : > { %v994_v39 = vadd.f32 %v993_v42, %v905_v21  ;;  %v1236_v9 = vmax.f32 %v984_v52, 0.0  ;;  %v1232_v42 = vmax.f32 %v979_v60, 0.0 }
 0x142   : > { %v1239_v11 = vmax.f32 %v1165_v4, 0.0 }
 0x143   : > { %v1244_v43 = vmax.f32 %v994_v39, 0.0  ;;  %v1167_v39 = vadd.f32 %v1166_v35, %v1078_v18  ;;  %v1230_v35 = vmax.f32 %v2543_v20, 0.0  ;;  %v1289_v50 = vpack.c.bf16 %v1236_v9, %v1234_v56 }
 0x144   : > { %v1082_v55 = vpop.f32.mrf.mxu2  ;;  %v1157_v18 = vadd.f32 %v2560_v46, %v1068_v40  ;;  %v1235_v20 = vmax.f32 %v1160_v17, 0.0 }
 0x145   : > { %v1083_v19 = vadd.f32 %v1082_v55, %v2447_v41  ;;  %v1171_v5 = vpop.f32.mrf.mxu3  ;;  %v1293_v38 = vpack.c.bf16 %v1244_v43, %v1242_v16  ;;  %v1243_v41 = vmax.f32 %v1170_v58, 0.0  ;;  %v1241_v31 = vmax.f32 %v1167_v39, 0.0 }
 0x146   : > { %v907_v7 = vpop.f32.mrf.mxu0  ;;  %v1287_v8 = vpack.c.bf16 %v1232_v42, %v1230_v35  ;;  %v1233_v45 = vmax.f32 %v1157_v18, 0.0 }
 0x147   : > { %v1172_v34 = vadd.f32 %v1171_v5, %v1083_v19  ;;  %1324 = vmatpush.bf16.msrb.mxu0 %v1293_v38  ;;  %v908_v47 = vadd.f32 %v907_v7, %v461_v27  ;;  %v1292_v43 = vpack.c.bf16 %v1241_v31, %v1239_v11  ;;  %v1290_v19 = vpack.c.bf16 %v1237_v44, %v1235_v20 }
 0x148   : > { %v996_v21 = vpop.f32.mrf.mxu1  ;;  %v1231_v38 = vmax.f32 %v2550_v30, 0.0  ;;  %v2615_v30 = vld [vmem:[%s2728_s3] sm:$0xff] }
 0x149   : > { %v1245_v61 = vmax.f32 %v1172_v34, 0.0  ;;  %v997_v32 = vadd.f32 %v996_v21, %v908_v47 }
 0x14a   : > { %v1288_v34 = vpack.c.bf16 %v1233_v45, %v1231_v38 }
 0x14b   : > { %1325 = vmatpush.bf16.msrb.mxu0 %v1291_v26  ;;  %v1294_v0 = vpack.c.bf16 %v1245_v61, %v1243_v41  ;;  %v1246_v63 = vmax.f32 %v997_v32, 0.0  ;;  %v1318_v26 = vunpack.c.l.b16 %v2615_v30 }
 0x14c   : > { %v1085_v10 = vpop.f32.mrf.mxu2 }
 0x14d   : > { %v1086_v16 = vadd.f32 %v1085_v10, %v461_v27  ;;  %v1174_v3 = vpop.f32.mrf.mxu3  ;;  %1350 = vmatpush.bf16.msrb.mxu2 %v1294_v0  ;;  %v1320_v0 = vpack.c.b16 %v1318_v26, %v1318_v26 }
 0x14e   : > { %v909_v62 = vpop.f32.mrf.mxu0 }
 0x14f   : > { %v1175_v2 = vadd.f32 %v1174_v3, %v1086_v16  ;;  %1326 = vmatpush.bf16.msrb.mxu0 %v1289_v50  ;;  %v910_v57 = vadd.f32 %v909_v62, %v466_v36 }
 0x150   : > { %v998_v52 = vpop.f32.mrf.mxu1 }
 0x151   : > { %1351 = vmatpush.bf16.msrb.mxu2 %v1292_v43  ;;  %v999_v55 = vadd.f32 %v998_v52, %v910_v57  ;;  %v1247_v56 = vmax.f32 %v1175_v2, 0.0 }
 0x153   : > { %v1248_v58 = vmax.f32 %v999_v55, 0.0  ;;  %1327 = vmatpush.bf16.msrb.mxu0 %v1287_v8 }
 0x154   : > { %v1087_v5 = vpop.f32.mrf.mxu2 }
 0x155   : > { %v1088_v46 = vadd.f32 %v1087_v5, %v466_v36  ;;  %v1176_v60 = vpop.f32.mrf.mxu3  ;;  %1352 = vmatpush.bf16.msrb.mxu2 %v1290_v19  ;;  %v2607_v7 = vpack.c.bf16 %v1248_v58, %v1246_v63 }
 0x156   : > { %v912_v27 = vpop.f32.mrf.mxu0 }
 0x157   : > { %v1177_v29 = vadd.f32 %v1176_v60, %v1088_v46  ;;  %v913_v39 = vadd.f32 %v912_v27, %v2494_v12  ;;  %1328 = vmatpush.bf16.msrb.mxu0 %v2540_v6 }
 0x158   : > { %v1001_v47 = vpop.f32.mrf.mxu1 }
 0x159   : > { %v1249_v28 = vmax.f32 %v1177_v29, 0.0  ;;  %v1002_v9 = vadd.f32 %v1001_v47, %v913_v39  ;;  %1353 = vmatpush.bf16.msrb.mxu2 %v1288_v34 }
 0x15b   : > { %1329 = vmatpush.bf16.msrb.mxu0 %v2528_v25  ;;  %v2617_v4 = vpack.c.bf16 %v1249_v28, %v1247_v56  ;;  %v1250_v54 = vmax.f32 %v1002_v9, 0.0 }
 0x15c   : > { %v1090_v21 = vpop.f32.mrf.mxu2 }
 0x15d   : > { %v1091_v41 = vadd.f32 %v1090_v21, %v2494_v12  ;;  %v1179_v61 = vpop.f32.mrf.mxu3  ;;  %1354 = vmatpush.bf16.msrb.mxu2 %v2545_v51 }
 0x15e   : > { %v914_v6 = vpop.f32.mrf.mxu0 }
 0x15f   : > { %v1180_v32 = vadd.f32 %v1179_v61, %v1091_v41  ;;  %v915_v40 = vadd.f32 %v914_v6, %v2583_v59  ;;  %1330 = vmatpush.bf16.msrb.mxu0 %v2512_v33 }
 0x160   : > { %v1003_v25 = vpop.f32.mrf.mxu1 }
 0x161   : > { %v1004_v31 = vadd.f32 %v1003_v25, %v915_v40  ;;  %1355 = vmatpush.bf16.msrb.mxu2 %v2531_v24  ;;  %v1251_v16 = vmax.f32 %v1180_v32, 0.0 }
 0x163   : > { %v1252_v35 = vmax.f32 %v1004_v31, 0.0  ;;  %1331 = vmatpush.bf16.msrb.mxu0 %v2515_v53 }
 0x164   : > { %v1092_v12 = vpop.f32.mrf.mxu2 }
 0x165   : > { %v1093_v51 = vadd.f32 %v1092_v12, %v2583_v59  ;;  %v1181_v42 = vpop.f32.mrf.mxu3  ;;  %1356 = vmatpush.bf16.msrb.mxu2 %v2519_v23  ;;  %v2628_v10 = vpack.c.bf16 %v1252_v35, %v1250_v54 }
 0x166   : > { %v917_v36 = vpop.f32.mrf.mxu0  ;;  %1332 = vmatmul.bf16.vlgmr.msrb.gmra.mxu0 %v1320_v0 }
 0x167   : > { %v1182_v33 = vadd.f32 %v1181_v42, %v1093_v51  ;;  %v918_v17 = vadd.f32 %v917_v36, %v2500_v22 }
 0x168   : > { %v1006_v11 = vpop.f32.mrf.mxu1 }
 0x169   : > { %v1253_v24 = vmax.f32 %v1182_v33, 0.0  ;;  %v1007_v3 = vadd.f32 %v1006_v11, %v918_v17  ;;  %1357 = vmatpush.bf16.msrb.mxu2 %v2517_v13 }
 0x16b   : > { %v2632_v53 = vpack.c.bf16 %v1253_v24, %v1251_v16  ;;  %v1254_v43 = vmax.f32 %v1007_v3, 0.0 }
 0x16c   : > { %v1095_v50 = vpop.f32.mrf.mxu2  ;;  %1358 = vmatmul.bf16.vlgmr.msrb.gmra.mxu2 %v1320_v0 }
 0x16d   : > { %v1096_v59 = vadd.f32 %v1095_v50, %v2500_v22  ;;  %v1184_v23 = vpop.f32.mrf.mxu3 }
 0x16e   : > { %v919_v18 = vpop.f32.mrf.mxu0 }
 0x16f   : > { %v1185_v62 = vadd.f32 %v1184_v23, %v1096_v59  ;;  %v920_v44 = vadd.f32 %v919_v18, %v2481_v1 }
 0x170   : > { %v1008_v2 = vpop.f32.mrf.mxu1 }
 0x171   : > { %v1009_v57 = vadd.f32 %v1008_v2, %v920_v44  ;;  %v1255_v19 = vmax.f32 %v1185_v62, 0.0 }
 0x173   : > { %v1256_v52 = vmax.f32 %v1009_v57, 0.0 }
 0x174   : > { %v1097_v20 = vpop.f32.mrf.mxu2 }
 0x175   : > { %v1098_v63 = vadd.f32 %v1097_v20, %v2481_v1  ;;  %v1186_v55 = vpop.f32.mrf.mxu3  ;;  %v2637_v13 = vpack.c.bf16 %v1256_v52, %v1254_v43 }
 0x176   : > { %v922_v8 = vpop.f32.mrf.mxu0 }
 0x177   : > { %v1187_v45 = vadd.f32 %v1186_v55, %v1098_v63  ;;  %v923_v58 = vadd.f32 %v922_v8, %v2498_v15 }
 0x178   : > { %v1011_v22 = vpop.f32.mrf.mxu1 }
 0x179   : > { %v1257_v5 = vmax.f32 %v1187_v45, 0.0  ;;  %v1012_v38 = vadd.f32 %v1011_v22, %v923_v58 }
 0x17b   : > { %v2640_v46 = vpack.c.bf16 %v1257_v5, %v1255_v19  ;;  %v1258_v56 = vmax.f32 %v1012_v38, 0.0  ;;  %v2745_v5 = vld [vmem:[#allocation10_spill] sm:$0xff] }
 0x17c   : > { %v1100_v60 = vpop.f32.mrf.mxu2 }
 0x17d   : > { %v1101_v27 = vadd.f32 %v1100_v60, %v2498_v15  ;;  %v1189_v29 = vpop.f32.mrf.mxu3 }
 0x17e   : > { %v924_v39 = vpop.f32.mrf.mxu0 }
 0x17f   : > { %v1190_v34 = vadd.f32 %v1189_v29, %v1101_v27  ;;  %v925_v1 = vadd.f32 %v924_v39, %v2496_v14  ;;  %v2746_v27 = vld [vmem:[#allocation9_spill] sm:$0xff]  ;;  %v2747_v39 = vld [vmem:[#allocation8_spill] sm:$0xff] }
 0x180   : > { %v1013_v47 = vpop.f32.mrf.mxu1 }
 0x181   : > { %v1014_v28 = vadd.f32 %v1013_v47, %v925_v1  ;;  %v1259_v25 = vmax.f32 %v1190_v34, 0.0 }
 0x183   : > { %v1260_v9 = vmax.f32 %v1014_v28, 0.0 }
 0x184   : > { %v1102_v21 = vpop.f32.mrf.mxu2 }
 0x185   : > { %v1103_v41 = vadd.f32 %v1102_v21, %v2496_v14  ;;  %v1191_v61 = vpop.f32.mrf.mxu3  ;;  %v2645_v6 = vpack.c.bf16 %v1260_v9, %v1258_v56  ;;  %v2748_v9 = vld [vmem:[#allocation11_spill] sm:$0xff] }
 0x186   : > { %v927_v26 = vpop.f32.mrf.mxu0 }
 0x187   : > { %v1192_v32 = vadd.f32 %v1191_v61, %v1103_v41  ;;  %v928_v40 = vadd.f32 %v927_v26, %v2453_v48 }
 0x188   : > { %v1016_v15 = vpop.f32.mrf.mxu1 }
 0x189   : > { %v1261_v54 = vmax.f32 %v1192_v32, 0.0  ;;  %v2648_v31 = vadd.f32 %v1016_v15, %v928_v40  ;;  %v2749_v40 = vld [vmem:[#allocation12_spill] sm:$0xff] }
 0x18b   : > { %v2650_v0 = vpack.c.bf16 %v1261_v54, %v1259_v25 }
 0x18c   : > { %v1105_v35 = vpop.f32.mrf.mxu2 }
 0x18d   : > { %v1106_v12 = vadd.f32 %v1105_v35, %v2453_v48  ;;  %v1194_v51 = vpop.f32.mrf.mxu3 }
 0x18e   : > { %v929_v42 = vpop.f32.mrf.mxu0 }
 0x18f   : > { %v2653_v14 = vadd.f32 %v1194_v51, %v1106_v12  ;;  %v930_v15 = vadd.f32 %v929_v42, %v2749_v40 }
 0x190   : > { %v1018_v36 = vpop.f32.mrf.mxu1 }
 0x194   : > { %v1107_v33 = vpop.f32.mrf.mxu2 }
 0x195   : > { %v2655_v17 = vpop.f32.mrf.mxu3 }
 0x196   : > { %v932_v11 = vpop.f32.mrf.mxu0 }
 0x197   : > { %v933_v21 = vadd.f32 %v932_v11, %v2748_v9 }
 0x198   : > { %v1021_v16 = vpop.f32.mrf.mxu1 }
 0x19c   : > { %v1110_v24 = vpop.f32.mrf.mxu2 }
 0x19d   : > { %v2657_v3 = vpop.f32.mrf.mxu3  ;;  %v1111_v42 = vadd.f32 %v1110_v24, %v2748_v9 }
 0x19e   : > { %v934_v50 = vpop.f32.mrf.mxu0 }
 0x19f   : > { %v935_v34 = vadd.f32 %v934_v50, %v2747_v39 }
 0x1a0   : > { %v1023_v59 = vpop.f32.mrf.mxu1 }
 0x1a1   : > { %v1024_v25 = vadd.f32 %v1023_v59, %v935_v34 }
 0x1a3   : > { %v1268_v59 = vmax.f32 %v1024_v25, 0.0 }
 0x1a4   : > { %v1112_v23 = vpop.f32.mrf.mxu2 }
 0x1a5   : > { %v1201_v18 = vpop.f32.mrf.mxu3  ;;  %v1113_v11 = vadd.f32 %v1112_v23, %v2747_v39  ;;  %v1262_v23 = vmax.f32 %v2648_v31, 0.0  ;;  %v1263_v39 = vmax.f32 %v2653_v14, 0.0 }
 0x1a6   : > { %v937_v62 = vpop.f32.mrf.mxu0 }
 0x1a7   : > { %v938_v38 = vadd.f32 %v937_v62, %v2745_v5 }
 0x1a8   : > { %v1026_v44 = vpop.f32.mrf.mxu1 }
 0x1a9   : > { %v1027_v41 = vadd.f32 %v1026_v44, %v938_v38 }
 0x1ab   : > { %v1270_v44 = vmax.f32 %v1027_v41, 0.0 }
 0x1ac   : > { %v1115_v48 = vpop.f32.mrf.mxu2 }
 0x1ad   : > { %v1204_v2 = vpop.f32.mrf.mxu3  ;;  %v1116_v54 = vadd.f32 %v1115_v48, %v2745_v5  ;;  %v1200_v5 = vadd.f32 %v2657_v3, %v1111_v42 }
 0x1ae   : > { %v939_v43 = vpop.f32.mrf.mxu0 }
 0x1af   : > { %v940_v58 = vadd.f32 %v939_v43, %v2455_v49 }
 0x1b0   : > { %v1028_v57 = vpop.f32.mrf.mxu1 }
 0x1b1   : > { %v1029_v47 = vadd.f32 %v1028_v57, %v940_v58 }
 0x1b3   : > { %v1272_v12 = vmax.f32 %v1029_v47, 0.0 }
 0x1b4   : > { %v1117_v52 = vpop.f32.mrf.mxu2 }
 0x1b5   : > { %v1206_v20 = vpop.f32.mrf.mxu3  ;;  %v1118_v61 = vadd.f32 %v1117_v52, %v2455_v49  ;;  %v1019_v52 = vadd.f32 %v1018_v36, %v930_v15 }
 0x1b6   : > { %v942_v63 = vpop.f32.mrf.mxu0 }
 0x1b7   : > { %v943_v8 = vadd.f32 %v942_v63, %v2439_v37  ;;  %v1207_v57 = vadd.f32 %v1206_v20, %v1118_v61  ;;  %v1205_v63 = vadd.f32 %v1204_v2, %v1116_v54  ;;  %v1264_v20 = vmax.f32 %v1019_v52, 0.0 }
 0x1b8   : > { %v1031_v55 = vpop.f32.mrf.mxu1 }
 0x1b9   : > { %v1032_v60 = vadd.f32 %v1031_v55, %v943_v8  ;;  %v1307_v8 = vpack.c.bf16 %v1272_v12, %v1270_v44  ;;  %v1271_v36 = vmax.f32 %v1205_v63, 0.0 }
 0x1bb   : > { %v1274_v26 = vmax.f32 %v1032_v60, 0.0 }
 0x1bc   : > { %v1120_v45 = vpop.f32.mrf.mxu2 }
 0x1bd   : > { %v1209_v22 = vpop.f32.mrf.mxu3  ;;  %v1121_v56 = vadd.f32 %v1120_v45, %v2439_v37  ;;  %v1022_v37 = vadd.f32 %v1021_v16, %v933_v21  ;;  %v1108_v45 = vadd.f32 %v1107_v33, %v2749_v40  ;;  %v1273_v16 = vmax.f32 %v1207_v57, 0.0 }
 0x1be   : > { %v944_v19 = vpop.f32.mrf.mxu0  ;;  %v1303_v33 = vpack.c.bf16 %v1264_v20, %v1262_v23 }
 0x1bf   : > { %v945_v29 = vadd.f32 %v944_v19, %v2746_v27  ;;  %v1210_v51 = vadd.f32 %v1209_v22, %v1121_v56  ;;  %v1266_v58 = vmax.f32 %v1022_v37, 0.0  ;;  %v1202_v22 = vadd.f32 %v1201_v18, %v1113_v11 }
 0x1c0   : > { %v1033_v1 = vpop.f32.mrf.mxu1  ;;  %v1197_v2 = vadd.f32 %v2655_v17, %v1108_v45  ;;  %v1308_v60 = vpack.c.bf16 %v1273_v16, %v1271_v36  ;;  %v1319_v17 = vunpack.c.h.b16 %v2615_v30  ;;  %v1315_v30 = vpop.permute.xlu2 %1314 }
 0x1c1   : > { %v1034_v28 = vadd.f32 %v1033_v1, %v945_v29  ;;  %v1275_v48 = vmax.f32 %v1210_v51, 0.0  ;;  %v1305_v24 = vpack.c.bf16 %v1268_v59, %v1266_v58  ;;  %v1269_v38 = vmax.f32 %v1202_v22, 0.0 }
 0x1c2   : > { %v1265_v18 = vmax.f32 %v1197_v2, 0.0  ;;  %v1321_v3 = vpack.c.b16 %v1319_v17, %v1319_v17 }
 0x1c3   : > { %v1276_v32 = vmax.f32 %v1034_v28, 0.0 }
 0x1c4   : > { %v1122_v35 = vpop.f32.mrf.mxu2  ;;  %v1304_v31 = vpack.c.bf16 %v1265_v18, %v1263_v39 }
 0x1c5   : > { %v1123_v50 = vadd.f32 %v1122_v35, %v2746_v27  ;;  %v1309_v62 = vpack.c.bf16 %v1276_v32, %v1274_v26  ;;  %v1211_v43 = vpop.f32.mrf.mxu3  ;;  %v1267_v27 = vmax.f32 %v1200_v5, 0.0 }
 0x1c7   : > { %v1212_v49 = vadd.f32 %v1211_v43, %v1123_v50  ;;  %1337 = vmatpush.bf16.msrb.mxu1 %v1309_v62  ;;  %v1306_v29 = vpack.c.bf16 %v1269_v38, %v1267_v27 }
 0x1c9   : > { %v1277_v55 = vmax.f32 %v1212_v49, 0.0 }
 0x1cb   : > { %1338 = vmatpush.bf16.msrb.mxu1 %v1307_v8  ;;  %v1310_v19 = vpack.c.bf16 %v1277_v55, %v1275_v48 }
 0x1cd   : > { %1363 = vmatpush.bf16.msrb.mxu3 %v1310_v19 }
 0x1cf   : > { %1339 = vmatpush.bf16.msrb.mxu1 %v1305_v24 }
 0x1d1   : > { %1364 = vmatpush.bf16.msrb.mxu3 %v1308_v60 }
 0x1d3   : > { %1340 = vmatpush.bf16.msrb.mxu1 %v1303_v33 }
 0x1d5   : > { %1365 = vmatpush.bf16.msrb.mxu3 %v1306_v29 }
 0x1d7   : > { %1341 = vmatpush.bf16.msrb.mxu1 %v2645_v6 }
 0x1d9   : > { %1366 = vmatpush.bf16.msrb.mxu3 %v1304_v31 }
 0x1db   : > { %1342 = vmatpush.bf16.msrb.mxu1 %v2637_v13 }
 0x1dd   : > { %1367 = vmatpush.bf16.msrb.mxu3 %v2650_v0 }
 0x1df   : > { %1343 = vmatpush.bf16.msrb.mxu1 %v2628_v10 }
 0x1e1   : > { %1368 = vmatpush.bf16.msrb.mxu3 %v2640_v46 }
 0x1e3   : > { %v1333_v34 = vpop.f32.mrf.mxu0  ;;  %1344 = vmatpush.bf16.msrb.mxu1 %v2607_v7 }
 0x1e4   : > { %v1334_v14 = vadd.f32 %v1333_v34, %v1315_v30 }
 0x1e5   : > { %1369 = vmatpush.bf16.msrb.mxu3 %v2632_v53 }
 0x1e6   : > { %1345 = vmatmul.bf16.vlgmr.msrb.gmra.mxu1 %v1321_v3 }
 0x1e9   : > { %1370 = vmatpush.bf16.msrb.mxu3 %v2617_v4 }
 0x1eb   : > { %v1335_v6 = vpop.f32.mrf.mxu0 }
 0x1ec   : > { %1371 = vmatmul.bf16.vlgmr.msrb.gmra.mxu3 %v1321_v3 }
 0x1ef   : > { %v1359_v13 = vpop.f32.mrf.mxu2 }
 0x1f0   : > { %v1360_v4 = vadd.f32 %v1359_v13, %v1315_v30 }
 0x1f7   : > { %v1361_v0 = vpop.f32.mrf.mxu2 }
 0x263   : > { %v1346_v10 = vpop.f32.mrf.mxu1 }
 0x264   : > { %v1347_v46 = vadd.f32 %v1346_v10, %v1334_v14 }
 0x266   : > { %1376 = vst [vmem:[%s274_s9] sm:$0xff] %v1347_v46 }
 0x26b   : > { %v1348_v7 = vpop.f32.mrf.mxu1 }
 0x26f   : > { %v1372_v53 = vpop.f32.mrf.mxu3 }
 0x270   : > { %v1373_v1 = vadd.f32 %v1372_v53, %v1360_v4 }
 0x272   : > { %1377 = vst [vmem:[%s274_s9 + $0x8] sm:$0xff] %v1373_v1 }
 0x273   : > { %1956 = shalt.err (!%p1953_p13)
}
 0x274   : > { %1833 = dma.vmem_to_hbm [thread:$0]  (%p2097_p9), %s1395_s30, 256, %s1397_s17, %s1379_s24  }
 0x277   : > { %v1374_v47 = vpop.f32.mrf.mxu3 }
 0x278 PF: > { %s1408_s29 = sand.u32 1, %s1991_s18   ;;  %p1840_p0 = pnand %p1497_p12, %p2104_p11 }
 0x279   : > { %s1409_s9 = scalar_lea.sflag [#allocation4], %s1408_s29 }
 0x27a   : > { %p1841_p1 = pneg %p1840_p0 }
 0x27c   : > { %1986 = dma.done.wait (%p1841_p1), %s1409_s9, 256  }
 0x27d   : > { %1988 = vsyncadd (%p1841_p1), %s1409_s9, 4294967040  ;;  %s21_s23 = sadd.s32 1, %s2011_s23   ;;  %s2750_s18 = smov %s1995_s19 }
 0x27e   : > { %p18_p2 = scmp.ge.s32.totalorder %s21_s23, 4   ;;  %s2751_s19 = smov %s1999_s20 }
 0x27f   : > { %s2752_s20 = smov %s2102_s7  ;;  %s2753_s21 = smov %s2007_s22 }
 0x280   : > { %s2754_s22 = smov %s2756_s26  ;;  %20 = sbr.rel (!%p18_p2) target bundleno = 6 (0x6), region = 88 }
 0x285   :  { %1415 = vsyncpa [#allocation3], 1 }
 0x286   :  { %1417 = vsyncpa [#allocation3 + $0x1], 1 }
 0x287   :  { %1418 = vsyncpa [#allocation4], 1 }
 0x288   :  { %1420 = vsyncpa [#allocation4 + $0x1], 1 }

</bundles_post_ra>
